<compile_context>
chip_gen: v5e
topology: v5e:2x2
jax: 0.10.0
libtpu: 0.0.40
codegen_flags: <defaults>
</compile_context>

<pallas_src>
import jax
import jax.numpy as jnp
from jax import lax
from jax.experimental import pallas as pl
from jax.experimental.pallas import tpu as pltpu

# ----------------------------- model hyper-params -----------------------------
FEATURE_DIM = 32          # para_feature_dim
LABEL_DIM   = 4           # para_label_dim
LATENT0     = 32          # para_latent_dim[0]
LATENT1     = 16          # para_latent_dim[1]
SHAPE0      = 8           # para_shape[0]
SHAPE1      = 16          # para_shape[1]
NEG_SLOPE   = 0.01        # nn.LeakyReLU default
NORM_EPS    = 1e-12       # F.normalize default eps

H1 = SHAPE0 * SHAPE1      # 128 : flat attention width
HG = LABEL_DIM * LATENT1  # 64  : flat GIN width


def _leaky(x):
    return jnp.where(x >= 0, x, NEG_SLOPE * x)


def _round_up(a, b):
    return ((a + b - 1) // b) * b


# ============================ fused forward kernel ============================
def lsdf_fused_kernel(x_ref, w1_ref, b1_ref, wqkv_ref, bqkv_ref, seg_ref,
                      simmat_ref, denmat_ref, bcmat_ref, expmat_ref,
                      wm_ref, bm_ref, w3a_ref, b3a_ref, w3b_ref, b3b_ref,
                      mw_ref, bg_ref, wc_ref, bc_ref, o_ref):
    f32 = jnp.float32

    # ---- NN1: Linear(feature_dim -> S0*S1) + LeakyReLU ----------------------
    h1 = _leaky(jnp.dot(x_ref[...], w1_ref[...],
                        preferred_element_type=f32) + b1_ref[...])       # (bn,128)

    # ---- NN2: attention over the (S0, S1) view, kept flat as (bn, 128) ------
    # Q | K | V in one 128->384 matmul (block-diagonal kron'd weights),
    # then 128-lane-aligned slices.
    qkv = jnp.dot(h1, wqkv_ref[...], preferred_element_type=f32) + bqkv_ref[...]
    q = qkv[:, 0 * H1:1 * H1]
    k = qkv[:, 1 * H1:2 * H1]
    v = qkv[:, 2 * H1:3 * H1]

    # F.normalize(p=2, dim=-1) per 16-lane segment.  seg = kron(I8, ones(16,16))
    # gives the per-segment sum of squares broadcast back over the segment.
    seg = seg_ref[...]
    q_ss = jnp.dot(q * q, seg, preferred_element_type=f32)
    k_ss = jnp.dot(k * k, seg, preferred_element_type=f32)
    qn = q * lax.rsqrt(jnp.maximum(q_ss, NORM_EPS * NORM_EPS))
    kn = k * lax.rsqrt(jnp.maximum(k_ss, NORM_EPS * NORM_EPS))

    # For shift s, roll by s*16 lanes maps key/value segment (i-s)%8 under
    # query segment i.  prods[s][b, i*16+d] = qn[b,i,d] * kn[b,(i-s)%8,d].
    # Rolls are XLU lane rotations (separate issue slot from the MXU).
    prods = []
    vrolls = []
    for s in range(SHAPE0):
        if s == 0:
            kr, vr = kn, v
        else:
            kr = pltpu.roll(kn, shift=s * SHAPE1, axis=1)
            vr = pltpu.roll(v, shift=s * SHAPE1, axis=1)
        prods.append(qn * kr)
        vrolls.append(vr)
    prod_cat = jnp.concatenate(prods, axis=1)                           # (bn,1024)

    # sims[:, s*8+i] = <qn_i, kn_{(i-s)%8}> in [-1,1] (both L2-normalized), so
    # the softmax max-subtraction is unnecessary (softmax is shift-invariant).
    sims = jnp.dot(prod_cat, simmat_ref[...], preferred_element_type=f32)  # (bn,64)
    exps = jnp.exp(sims)                                                    # one dense exp
    denom = jnp.dot(exps, denmat_ref[...], preferred_element_type=f32)      # (bn,8)
    inv_denom = pl.reciprocal(denom, approx=True)                           # EUP slot
    p_all = exps * jnp.dot(inv_denom, bcmat_ref[...],
                           preferred_element_type=f32)                      # (bn,64)
    attw = jnp.dot(p_all, expmat_ref[...], preferred_element_type=f32)      # (bn,1024)

    att = attw[:, 0:H1] * vrolls[0]
    for s in range(1, SHAPE0):
        att = att + attw[:, s * H1:(s + 1) * H1] * vrolls[s]                # (bn,128)

    # Attention MLP([S1, S1], leaky_relu), applied per segment (kron'd weight).
    h2 = _leaky(jnp.dot(att, wm_ref[...], preferred_element_type=f32) + bm_ref[...])

    # ---- NN3: MLP([S0*S1, latent0, latent1*label_dim], leaky, leaky) --------
    h3a = _leaky(jnp.dot(h2, w3a_ref[...], preferred_element_type=f32) + b3a_ref[...])
    h3b = _leaky(jnp.dot(h3a, w3b_ref[...], preferred_element_type=f32) + b3b_ref[...])  # (bn,64)

    # ---- NN4: GIN layer (+ residual), then grouped Conv1d classifier --------
    # mw = ((1+eps)*I64 + kron(adj^T, I16)) @ kron(I4, wg)  (folded in wrapper)
    r = _leaky(jnp.dot(h3b, mw_ref[...], preferred_element_type=f32) + bg_ref[...]) + h3b
    o_ref[...] = jnp.dot(r, wc_ref[...], preferred_element_type=f32) + bc_ref[...]


# ================== wrapper: precompute structured weights ====================
def _build_operands(p, adj):
    f32 = jnp.float32
    i4 = jnp.eye(LABEL_DIM, dtype=f32)
    i8 = jnp.eye(SHAPE0, dtype=f32)
    i16 = jnp.eye(SHAPE1, dtype=f32)

    # Q|K|V projection as one block-diagonal (128, 384) matrix.
    wqkv = jnp.concatenate([jnp.kron(i8, p["wq"]),
                            jnp.kron(i8, p["wk"]),
                            jnp.kron(i8, p["wv"])], axis=1)              # (128,384)
    bqkv = jnp.concatenate([jnp.tile(p["bq"], (1, SHAPE0)),
                            jnp.tile(p["bk"], (1, SHAPE0)),
                            jnp.tile(p["bv"], (1, SHAPE0))], axis=1)     # (1,384)

    seg = jnp.kron(i8, jnp.ones((SHAPE1, SHAPE1), f32))                  # (128,128)
    sumseg = jnp.kron(i8, jnp.ones((SHAPE1, 1), f32))                    # (128,8)
    brd = jnp.kron(i8, jnp.ones((1, SHAPE1), f32))                       # (8,128)

    simmat = jnp.kron(i8, sumseg)                                        # (1024,64)
    denmat = jnp.tile(i8, (SHAPE0, 1))                                   # (64,8)
    bcmat = jnp.tile(i8, (1, SHAPE0))                                    # (8,64)
    expmat = jnp.kron(i8, brd)                                           # (64,1024)

    wm_big = jnp.kron(i8, p["wm"])                                       # (128,128)
    bm_t = jnp.tile(p["bm"], (1, SHAPE0))                                # (1,128)

    # GIN aggregation and its per-label 16->16 weight folded into one matrix.
    madj = ((1.0 + p["eps"][0, 0]) * jnp.eye(HG, dtype=f32)
            + jnp.kron(adj.T, i16))                                      # (64,64)
    mw = madj @ jnp.kron(i4, p["wg"])                                    # (64,64)
    bg_t = jnp.tile(p["bg"], (1, LABEL_DIM))                             # (1,64)

    # Grouped Conv1d(L, L, k=latent1, groups=L) -> block-selective (64, 4) matrix.
    wc_sel = (p["wc"][:, :, None] * i4[:, None, :]).reshape(HG, LABEL_DIM)
    bc_row = p["bc"].reshape(1, LABEL_DIM)

    return (p["w1"], p["b1"], wqkv, bqkv, seg, simmat, denmat, bcmat, expmat,
            wm_big, bm_t, p["w3a"], p["b3a"], p["w3b"], p["b3b"],
            mw, bg_t, wc_sel, bc_row)


def lsdf_forward(x, adj, p, block_n=512):
    n = x.shape[0]
    operands = _build_operands(p, adj)

    bn = block_n if n >= block_n else _round_up(n, 8)
    n_pad = _round_up(n, bn)
    if n_pad != n:
        x = jnp.concatenate(
            [x, jnp.zeros((n_pad - n, FEATURE_DIM), x.dtype)], axis=0)

    in_specs = [pl.BlockSpec((bn, FEATURE_DIM), lambda i: (i, 0))]
    in_specs += [pl.BlockSpec(w.shape, lambda i: (0, 0)) for w in operands]

    scores = pl.pallas_call(
        lsdf_fused_kernel,
        out_shape=jax.ShapeDtypeStruct((n_pad, LABEL_DIM), jnp.float32),
        grid=(n_pad // bn,),
        in_specs=in_specs,
        out_specs=pl.BlockSpec((bn, LABEL_DIM), lambda i: (i, 0)),
        compiler_params=pltpu.CompilerParams(
            dimension_semantics=("parallel",),
            vmem_limit_bytes=32 * 1024 * 1024),
    )(x, *operands)
    return scores[:n]


# ============================ parameter init (deterministic) ==================
def _linear_params(kw, kb, fan_in, fan_out, a=0.1):
    # kaiming_uniform_(a=0.1, nonlinearity='leaky_relu'); bias ~ U[0, 0.1)
    gain = (2.0 / (1.0 + a * a)) ** 0.5
    bound = gain * (3.0 / fan_in) ** 0.5
    w = jax.random.uniform(kw, (fan_in, fan_out), jnp.float32, -bound, bound)
    b = jax.random.uniform(kb, (1, fan_out), jnp.float32, 0.0, 0.1)
    return w, b


def init_params(key):
    ks = jax.random.split(key, 20)
    p = {}
    h1 = SHAPE0 * SHAPE1
    p["w1"], p["b1"] = _linear_params(ks[0], ks[1], FEATURE_DIM, h1)
    p["wq"], p["bq"] = _linear_params(ks[2], ks[3], SHAPE1, SHAPE1)
    p["wk"], p["bk"] = _linear_params(ks[4], ks[5], SHAPE1, SHAPE1)
    p["wv"], p["bv"] = _linear_params(ks[6], ks[7], SHAPE1, SHAPE1)
    p["wm"], p["bm"] = _linear_params(ks[8], ks[9], SHAPE1, SHAPE1)
    p["w3a"], p["b3a"] = _linear_params(ks[10], ks[11], h1, LATENT0)
    p["w3b"], p["b3b"] = _linear_params(ks[12], ks[13], LATENT0, LATENT1 * LABEL_DIM)
    p["wg"], p["bg"] = _linear_params(ks[14], ks[15], LATENT1, LATENT1)
    p["eps"] = jnp.zeros((1, 1), jnp.float32)                       # GIN eps init 0.0
    cbound = 1.0 / (LATENT1 ** 0.5)
    p["wc"] = jax.random.uniform(ks[16], (LABEL_DIM, LATENT1), jnp.float32, -cbound, cbound)
    p["bc"] = jax.random.uniform(ks[17], (LABEL_DIM, 1), jnp.float32, -cbound, cbound)
    return p


# ============================ pure-JAX reference ==============================
def lsdf_reference(x, adj, p):
    n = x.shape[0]
    h = _leaky(x @ p["w1"] + p["b1"]).reshape(n, SHAPE0, SHAPE1)
    q = h @ p["wq"] + p["bq"]
    k = h @ p["wk"] + p["bk"]
    v = h @ p["wv"] + p["bv"]
    qn = q / jnp.maximum(jnp.linalg.norm(q, axis=-1, keepdims=True), NORM_EPS)
    kn = k / jnp.maximum(jnp.linalg.norm(k, axis=-1, keepdims=True), NORM_EPS)
    sim = jax.nn.softmax(jnp.einsum("nse,nte->nst", qn, kn), axis=-1)
    att = jnp.einsum("nst,nte->nse", sim, v)
    h = _leaky(att @ p["wm"] + p["bm"]).reshape(n, SHAPE0 * SHAPE1)
    h = _leaky(h @ p["w3a"] + p["b3a"])
    h = _leaky(h @ p["w3b"] + p["b3b"]).reshape(n, LABEL_DIM, LATENT1)
    neighs = jnp.einsum("lk,nkd->nld", adj, h)
    r = (1.0 + p["eps"][0, 0]) * h + neighs
    r = _leaky(r @ p["wg"] + p["bg"]) + h
    return jnp.sum(p["wc"][None] * r, axis=-1) + p["bc"][:, 0][None]


# ============================ main ============================================
if __name__ == "__main__":
    key = jax.random.PRNGKey(0)
    kx, kadj, kp = jax.random.split(key, 3)

    n = 2
    x = jax.random.normal(kx, (n, FEATURE_DIM), jnp.float32)
    a = jax.random.bernoulli(kadj, 0.5, (LABEL_DIM, LABEL_DIM)).astype(jnp.float32)
    adj = jnp.maximum(a, a.T)  # symmetric adjacency over labels

    params = init_params(kp)

    scores = lsdf_forward(x, adj, params)
    scores = jax.block_until_ready(scores)

    assert scores.shape == (n, LABEL_DIM), scores.shape
    ref = lsdf_reference(x, adj, params)
    assert jnp.all(jnp.isfinite(scores))
    # approx reciprocal in the softmax denominator gives ~1e-3 relative deviation
    assert jnp.allclose(scores, ref, rtol=2e-2, atol=2e-2), (scores, ref)

    print("KERNEL_OK")
</pallas_src>

<mosaic_0001>
module attributes {stable_mosaic.version = 11 : i64} {
  func.func @lsdf_fused_kernel(%arg0: i32, %arg1: memref<8x32xf32, #tpu.memory_space<vmem>>, %arg2: memref<32x128xf32, #tpu.memory_space<vmem>>, %arg3: memref<1x128xf32, #tpu.memory_space<vmem>>, %arg4: memref<128x384xf32, #tpu.memory_space<vmem>>, %arg5: memref<1x384xf32, #tpu.memory_space<vmem>>, %arg6: memref<128x128xf32, #tpu.memory_space<vmem>>, %arg7: memref<1024x64xf32, #tpu.memory_space<vmem>>, %arg8: memref<64x8xf32, #tpu.memory_space<vmem>>, %arg9: memref<8x64xf32, #tpu.memory_space<vmem>>, %arg10: memref<64x1024xf32, #tpu.memory_space<vmem>>, %arg11: memref<128x128xf32, #tpu.memory_space<vmem>>, %arg12: memref<1x128xf32, #tpu.memory_space<vmem>>, %arg13: memref<128x32xf32, #tpu.memory_space<vmem>>, %arg14: memref<1x32xf32, #tpu.memory_space<vmem>>, %arg15: memref<32x64xf32, #tpu.memory_space<vmem>>, %arg16: memref<1x64xf32, #tpu.memory_space<vmem>>, %arg17: memref<64x64xf32, #tpu.memory_space<vmem>>, %arg18: memref<1x64xf32, #tpu.memory_space<vmem>>, %arg19: memref<64x4xf32, #tpu.memory_space<vmem>>, %arg20: memref<1x4xf32, #tpu.memory_space<vmem>>, %arg21: memref<8x4xf32, #tpu.memory_space<vmem>>) attributes {dimension_semantics = [#tpu.dimension_semantics<parallel>], iteration_bounds = array<i64: 1>, scalar_prefetch = 0 : i64, scratch_operands = 0 : i64, tpu.core_type = #tpu.core_type<tc>, window_params = [{transform_indices = @transform_0, window_bounds = array<i64: 8, 32>}, {pipeline_mode = #tpu.pipeline_mode<synchronous>, transform_indices = @transform_1, window_bounds = array<i64: 32, 128>}, {pipeline_mode = #tpu.pipeline_mode<synchronous>, transform_indices = @transform_2, window_bounds = array<i64: 1, 128>}, {pipeline_mode = #tpu.pipeline_mode<synchronous>, transform_indices = @transform_3, window_bounds = array<i64: 128, 384>}, {pipeline_mode = #tpu.pipeline_mode<synchronous>, transform_indices = @transform_4, window_bounds = array<i64: 1, 384>}, {pipeline_mode = #tpu.pipeline_mode<synchronous>, transform_indices = @transform_5, window_bounds = array<i64: 128, 128>}, {pipeline_mode = #tpu.pipeline_mode<synchronous>, transform_indices = @transform_6, window_bounds = array<i64: 1024, 64>}, {pipeline_mode = #tpu.pipeline_mode<synchronous>, transform_indices = @transform_7, window_bounds = array<i64: 64, 8>}, {pipeline_mode = #tpu.pipeline_mode<synchronous>, transform_indices = @transform_8, window_bounds = array<i64: 8, 64>}, {pipeline_mode = #tpu.pipeline_mode<synchronous>, transform_indices = @transform_9, window_bounds = array<i64: 64, 1024>}, {pipeline_mode = #tpu.pipeline_mode<synchronous>, transform_indices = @transform_10, window_bounds = array<i64: 128, 128>}, {pipeline_mode = #tpu.pipeline_mode<synchronous>, transform_indices = @transform_11, window_bounds = array<i64: 1, 128>}, {pipeline_mode = #tpu.pipeline_mode<synchronous>, transform_indices = @transform_12, window_bounds = array<i64: 128, 32>}, {pipeline_mode = #tpu.pipeline_mode<synchronous>, transform_indices = @transform_13, window_bounds = array<i64: 1, 32>}, {pipeline_mode = #tpu.pipeline_mode<synchronous>, transform_indices = @transform_14, window_bounds = array<i64: 32, 64>}, {pipeline_mode = #tpu.pipeline_mode<synchronous>, transform_indices = @transform_15, window_bounds = array<i64: 1, 64>}, {pipeline_mode = #tpu.pipeline_mode<synchronous>, transform_indices = @transform_16, window_bounds = array<i64: 64, 64>}, {pipeline_mode = #tpu.pipeline_mode<synchronous>, transform_indices = @transform_17, window_bounds = array<i64: 1, 64>}, {pipeline_mode = #tpu.pipeline_mode<synchronous>, transform_indices = @transform_18, window_bounds = array<i64: 64, 4>}, {pipeline_mode = #tpu.pipeline_mode<synchronous>, transform_indices = @transform_19, window_bounds = array<i64: 1, 4>}, {transform_indices = @transform_20, window_bounds = array<i64: 8, 4>}]} {
    %c0 = arith.constant 0 : index
    %c0_0 = arith.constant 0 : index
    %0 = vector.load %arg1[%c0, %c0_0] : memref<8x32xf32, #tpu.memory_space<vmem>>, vector<8x32xf32>
    %c0_1 = arith.constant 0 : index
    %c0_2 = arith.constant 0 : index
    %1 = vector.load %arg2[%c0_1, %c0_2] : memref<32x128xf32, #tpu.memory_space<vmem>>, vector<32x128xf32>
    %cst = arith.constant dense<0.000000e+00> : vector<8x128xf32>
    %2 = tpu.matmul %0, %1, %cst {dimension_numbers = #tpu.dot_dimension_numbers<[1], [0], [0], [1], [0, 0, 1, 1], [], []>} : vector<8x32xf32>, vector<32x128xf32>, vector<8x128xf32> -> vector<8x128xf32>
    %c0_3 = arith.constant 0 : index
    %c0_4 = arith.constant 0 : index
    %3 = vector.load %arg3[%c0_3, %c0_4] : memref<1x128xf32, #tpu.memory_space<vmem>>, vector<1x128xf32>
    %4 = vector.broadcast %3 : vector<1x128xf32> to vector<8x128xf32>
    %5 = arith.addf %2, %4 : vector<8x128xf32>
    %cst_5 = arith.constant 0.000000e+00 : f32
    %6 = vector.broadcast %cst_5 : f32 to vector<8x128xf32>
    %7 = arith.cmpf oge, %5, %6 : vector<8x128xf32>
    %cst_6 = arith.constant 0.00999999977 : f32
    %8 = vector.broadcast %cst_6 : f32 to vector<8x128xf32>
    %9 = arith.mulf %8, %5 : vector<8x128xf32>
    %10 = arith.select %7, %5, %9 : vector<8x128xi1>, vector<8x128xf32>
    %c0_7 = arith.constant 0 : index
    %c0_8 = arith.constant 0 : index
    %11 = vector.load %arg4[%c0_7, %c0_8] : memref<128x384xf32, #tpu.memory_space<vmem>>, vector<128x384xf32>
    %cst_9 = arith.constant dense<0.000000e+00> : vector<8x384xf32>
    %12 = tpu.matmul %10, %11, %cst_9 {dimension_numbers = #tpu.dot_dimension_numbers<[1], [0], [0], [1], [0, 0, 1, 1], [], []>} : vector<8x128xf32>, vector<128x384xf32>, vector<8x384xf32> -> vector<8x384xf32>
    %c0_10 = arith.constant 0 : index
    %c0_11 = arith.constant 0 : index
    %13 = vector.load %arg5[%c0_10, %c0_11] : memref<1x384xf32, #tpu.memory_space<vmem>>, vector<1x384xf32>
    %14 = vector.broadcast %13 : vector<1x384xf32> to vector<8x384xf32>
    %15 = arith.addf %12, %14 : vector<8x384xf32>
    %16 = vector.extract_strided_slice %15 {offsets = [0, 0], sizes = [8, 128], strides = [1, 1]} : vector<8x384xf32> to vector<8x128xf32>
    %17 = vector.extract_strided_slice %15 {offsets = [0, 128], sizes = [8, 128], strides = [1, 1]} : vector<8x384xf32> to vector<8x128xf32>
    %18 = vector.extract_strided_slice %15 {offsets = [0, 256], sizes = [8, 128], strides = [1, 1]} : vector<8x384xf32> to vector<8x128xf32>
    %c0_12 = arith.constant 0 : index
    %c0_13 = arith.constant 0 : index
    %19 = vector.load %arg6[%c0_12, %c0_13] : memref<128x128xf32, #tpu.memory_space<vmem>>, vector<128x128xf32>
    %20 = arith.mulf %16, %16 : vector<8x128xf32>
    %cst_14 = arith.constant dense<0.000000e+00> : vector<8x128xf32>
    %21 = tpu.matmul %20, %19, %cst_14 {dimension_numbers = #tpu.dot_dimension_numbers<[1], [0], [0], [1], [0, 0, 1, 1], [], []>} : vector<8x128xf32>, vector<128x128xf32>, vector<8x128xf32> -> vector<8x128xf32>
    %22 = arith.mulf %17, %17 : vector<8x128xf32>
    %cst_15 = arith.constant dense<0.000000e+00> : vector<8x128xf32>
    %23 = tpu.matmul %22, %19, %cst_15 {dimension_numbers = #tpu.dot_dimension_numbers<[1], [0], [0], [1], [0, 0, 1, 1], [], []>} : vector<8x128xf32>, vector<128x128xf32>, vector<8x128xf32> -> vector<8x128xf32>
    %cst_16 = arith.constant 1.000000e-24 : f32
    %24 = vector.broadcast %cst_16 : f32 to vector<8x128xf32>
    %25 = arith.maximumf %21, %24 : vector<8x128xf32>
    %26 = math.rsqrt %25 : vector<8x128xf32>
    %27 = arith.mulf %16, %26 : vector<8x128xf32>
    %cst_17 = arith.constant 1.000000e-24 : f32
    %28 = vector.broadcast %cst_17 : f32 to vector<8x128xf32>
    %29 = arith.maximumf %23, %28 : vector<8x128xf32>
    %30 = math.rsqrt %29 : vector<8x128xf32>
    %31 = arith.mulf %17, %30 : vector<8x128xf32>
    %32 = arith.mulf %27, %31 : vector<8x128xf32>
    %c16_i32 = arith.constant 16 : i32
    %33 = tpu.dynamic_rotate %31 by %c16_i32 dim 1 : vector<8x128xf32>, i32 -> vector<8x128xf32>
    %c16_i32_18 = arith.constant 16 : i32
    %34 = tpu.dynamic_rotate %18 by %c16_i32_18 dim 1 : vector<8x128xf32>, i32 -> vector<8x128xf32>
    %35 = arith.mulf %27, %33 : vector<8x128xf32>
    %c32_i32 = arith.constant 32 : i32
    %36 = tpu.dynamic_rotate %31 by %c32_i32 dim 1 : vector<8x128xf32>, i32 -> vector<8x128xf32>
    %c32_i32_19 = arith.constant 32 : i32
    %37 = tpu.dynamic_rotate %18 by %c32_i32_19 dim 1 : vector<8x128xf32>, i32 -> vector<8x128xf32>
    %38 = arith.mulf %27, %36 : vector<8x128xf32>
    %c48_i32 = arith.constant 48 : i32
    %39 = tpu.dynamic_rotate %31 by %c48_i32 dim 1 : vector<8x128xf32>, i32 -> vector<8x128xf32>
    %c48_i32_20 = arith.constant 48 : i32
    %40 = tpu.dynamic_rotate %18 by %c48_i32_20 dim 1 : vector<8x128xf32>, i32 -> vector<8x128xf32>
    %41 = arith.mulf %27, %39 : vector<8x128xf32>
    %c64_i32 = arith.constant 64 : i32
    %42 = tpu.dynamic_rotate %31 by %c64_i32 dim 1 : vector<8x128xf32>, i32 -> vector<8x128xf32>
    %c64_i32_21 = arith.constant 64 : i32
    %43 = tpu.dynamic_rotate %18 by %c64_i32_21 dim 1 : vector<8x128xf32>, i32 -> vector<8x128xf32>
    %44 = arith.mulf %27, %42 : vector<8x128xf32>
    %c80_i32 = arith.constant 80 : i32
    %45 = tpu.dynamic_rotate %31 by %c80_i32 dim 1 : vector<8x128xf32>, i32 -> vector<8x128xf32>
    %c80_i32_22 = arith.constant 80 : i32
    %46 = tpu.dynamic_rotate %18 by %c80_i32_22 dim 1 : vector<8x128xf32>, i32 -> vector<8x128xf32>
    %47 = arith.mulf %27, %45 : vector<8x128xf32>
    %c96_i32 = arith.constant 96 : i32
    %48 = tpu.dynamic_rotate %31 by %c96_i32 dim 1 : vector<8x128xf32>, i32 -> vector<8x128xf32>
    %c96_i32_23 = arith.constant 96 : i32
    %49 = tpu.dynamic_rotate %18 by %c96_i32_23 dim 1 : vector<8x128xf32>, i32 -> vector<8x128xf32>
    %50 = arith.mulf %27, %48 : vector<8x128xf32>
    %c112_i32 = arith.constant 112 : i32
    %51 = tpu.dynamic_rotate %31 by %c112_i32 dim 1 : vector<8x128xf32>, i32 -> vector<8x128xf32>
    %c112_i32_24 = arith.constant 112 : i32
    %52 = tpu.dynamic_rotate %18 by %c112_i32_24 dim 1 : vector<8x128xf32>, i32 -> vector<8x128xf32>
    %53 = arith.mulf %27, %51 : vector<8x128xf32>
    %54 = tpu.concatenate %32, %35, %38, %41, %44, %47, %50, %53 in 1 : vector<8x128xf32>, vector<8x128xf32>, vector<8x128xf32>, vector<8x128xf32>, vector<8x128xf32>, vector<8x128xf32>, vector<8x128xf32>, vector<8x128xf32> -> vector<8x1024xf32>
    %c0_25 = arith.constant 0 : index
    %c0_26 = arith.constant 0 : index
    %55 = vector.load %arg7[%c0_25, %c0_26] : memref<1024x64xf32, #tpu.memory_space<vmem>>, vector<1024x64xf32>
    %cst_27 = arith.constant dense<0.000000e+00> : vector<8x64xf32>
    %56 = tpu.matmul %54, %55, %cst_27 {dimension_numbers = #tpu.dot_dimension_numbers<[1], [0], [0], [1], [0, 0, 1, 1], [], []>} : vector<8x1024xf32>, vector<1024x64xf32>, vector<8x64xf32> -> vector<8x64xf32>
    %57 = math.exp %56 : vector<8x64xf32>
    %c0_28 = arith.constant 0 : index
    %c0_29 = arith.constant 0 : index
    %58 = vector.load %arg8[%c0_28, %c0_29] : memref<64x8xf32, #tpu.memory_space<vmem>>, vector<64x8xf32>
    %cst_30 = arith.constant dense<0.000000e+00> : vector<8x8xf32>
    %59 = tpu.matmul %57, %58, %cst_30 {dimension_numbers = #tpu.dot_dimension_numbers<[1], [0], [0], [1], [0, 0, 1, 1], [], []>} : vector<8x64xf32>, vector<64x8xf32>, vector<8x8xf32> -> vector<8x8xf32>
    %60 = tpu.reciprocal %59 {approx = true} : vector<8x8xf32> -> vector<8x8xf32>
    %c0_31 = arith.constant 0 : index
    %c0_32 = arith.constant 0 : index
    %61 = vector.load %arg9[%c0_31, %c0_32] : memref<8x64xf32, #tpu.memory_space<vmem>>, vector<8x64xf32>
    %cst_33 = arith.constant dense<0.000000e+00> : vector<8x64xf32>
    %62 = tpu.matmul %60, %61, %cst_33 {dimension_numbers = #tpu.dot_dimension_numbers<[1], [0], [0], [1], [0, 0, 1, 1], [], []>} : vector<8x8xf32>, vector<8x64xf32>, vector<8x64xf32> -> vector<8x64xf32>
    %63 = arith.mulf %57, %62 : vector<8x64xf32>
    %c0_34 = arith.constant 0 : index
    %c0_35 = arith.constant 0 : index
    %64 = vector.load %arg10[%c0_34, %c0_35] : memref<64x1024xf32, #tpu.memory_space<vmem>>, vector<64x1024xf32>
    %cst_36 = arith.constant dense<0.000000e+00> : vector<8x1024xf32>
    %65 = tpu.matmul %63, %64, %cst_36 {dimension_numbers = #tpu.dot_dimension_numbers<[1], [0], [0], [1], [0, 0, 1, 1], [], []>} : vector<8x64xf32>, vector<64x1024xf32>, vector<8x1024xf32> -> vector<8x1024xf32>
    %66 = vector.extract_strided_slice %65 {offsets = [0, 0], sizes = [8, 128], strides = [1, 1]} : vector<8x1024xf32> to vector<8x128xf32>
    %67 = arith.mulf %66, %18 : vector<8x128xf32>
    %68 = vector.extract_strided_slice %65 {offsets = [0, 128], sizes = [8, 128], strides = [1, 1]} : vector<8x1024xf32> to vector<8x128xf32>
    %69 = arith.mulf %68, %34 : vector<8x128xf32>
    %70 = arith.addf %67, %69 : vector<8x128xf32>
    %71 = vector.extract_strided_slice %65 {offsets = [0, 256], sizes = [8, 128], strides = [1, 1]} : vector<8x1024xf32> to vector<8x128xf32>
    %72 = arith.mulf %71, %37 : vector<8x128xf32>
    %73 = arith.addf %70, %72 : vector<8x128xf32>
    %74 = vector.extract_strided_slice %65 {offsets = [0, 384], sizes = [8, 128], strides = [1, 1]} : vector<8x1024xf32> to vector<8x128xf32>
    %75 = arith.mulf %74, %40 : vector<8x128xf32>
    %76 = arith.addf %73, %75 : vector<8x128xf32>
    %77 = vector.extract_strided_slice %65 {offsets = [0, 512], sizes = [8, 128], strides = [1, 1]} : vector<8x1024xf32> to vector<8x128xf32>
    %78 = arith.mulf %77, %43 : vector<8x128xf32>
    %79 = arith.addf %76, %78 : vector<8x128xf32>
    %80 = vector.extract_strided_slice %65 {offsets = [0, 640], sizes = [8, 128], strides = [1, 1]} : vector<8x1024xf32> to vector<8x128xf32>
    %81 = arith.mulf %80, %46 : vector<8x128xf32>
    %82 = arith.addf %79, %81 : vector<8x128xf32>
    %83 = vector.extract_strided_slice %65 {offsets = [0, 768], sizes = [8, 128], strides = [1, 1]} : vector<8x1024xf32> to vector<8x128xf32>
    %84 = arith.mulf %83, %49 : vector<8x128xf32>
    %85 = arith.addf %82, %84 : vector<8x128xf32>
    %86 = vector.extract_strided_slice %65 {offsets = [0, 896], sizes = [8, 128], strides = [1, 1]} : vector<8x1024xf32> to vector<8x128xf32>
    %87 = arith.mulf %86, %52 : vector<8x128xf32>
    %88 = arith.addf %85, %87 : vector<8x128xf32>
    %c0_37 = arith.constant 0 : index
    %c0_38 = arith.constant 0 : index
    %89 = vector.load %arg11[%c0_37, %c0_38] : memref<128x128xf32, #tpu.memory_space<vmem>>, vector<128x128xf32>
    %cst_39 = arith.constant dense<0.000000e+00> : vector<8x128xf32>
    %90 = tpu.matmul %88, %89, %cst_39 {dimension_numbers = #tpu.dot_dimension_numbers<[1], [0], [0], [1], [0, 0, 1, 1], [], []>} : vector<8x128xf32>, vector<128x128xf32>, vector<8x128xf32> -> vector<8x128xf32>
    %c0_40 = arith.constant 0 : index
    %c0_41 = arith.constant 0 : index
    %91 = vector.load %arg12[%c0_40, %c0_41] : memref<1x128xf32, #tpu.memory_space<vmem>>, vector<1x128xf32>
    %92 = vector.broadcast %91 : vector<1x128xf32> to vector<8x128xf32>
    %93 = arith.addf %90, %92 : vector<8x128xf32>
    %cst_42 = arith.constant 0.000000e+00 : f32
    %94 = vector.broadcast %cst_42 : f32 to vector<8x128xf32>
    %95 = arith.cmpf oge, %93, %94 : vector<8x128xf32>
    %cst_43 = arith.constant 0.00999999977 : f32
    %96 = vector.broadcast %cst_43 : f32 to vector<8x128xf32>
    %97 = arith.mulf %96, %93 : vector<8x128xf32>
    %98 = arith.select %95, %93, %97 : vector<8x128xi1>, vector<8x128xf32>
    %c0_44 = arith.constant 0 : index
    %c0_45 = arith.constant 0 : index
    %99 = vector.load %arg13[%c0_44, %c0_45] : memref<128x32xf32, #tpu.memory_space<vmem>>, vector<128x32xf32>
    %cst_46 = arith.constant dense<0.000000e+00> : vector<8x32xf32>
    %100 = tpu.matmul %98, %99, %cst_46 {dimension_numbers = #tpu.dot_dimension_numbers<[1], [0], [0], [1], [0, 0, 1, 1], [], []>} : vector<8x128xf32>, vector<128x32xf32>, vector<8x32xf32> -> vector<8x32xf32>
    %c0_47 = arith.constant 0 : index
    %c0_48 = arith.constant 0 : index
    %101 = vector.load %arg14[%c0_47, %c0_48] : memref<1x32xf32, #tpu.memory_space<vmem>>, vector<1x32xf32>
    %102 = vector.broadcast %101 : vector<1x32xf32> to vector<8x32xf32>
    %103 = arith.addf %100, %102 : vector<8x32xf32>
    %cst_49 = arith.constant 0.000000e+00 : f32
    %104 = vector.broadcast %cst_49 : f32 to vector<8x32xf32>
    %105 = arith.cmpf oge, %103, %104 : vector<8x32xf32>
    %cst_50 = arith.constant 0.00999999977 : f32
    %106 = vector.broadcast %cst_50 : f32 to vector<8x32xf32>
    %107 = arith.mulf %106, %103 : vector<8x32xf32>
    %108 = arith.select %105, %103, %107 : vector<8x32xi1>, vector<8x32xf32>
    %c0_51 = arith.constant 0 : index
    %c0_52 = arith.constant 0 : index
    %109 = vector.load %arg15[%c0_51, %c0_52] : memref<32x64xf32, #tpu.memory_space<vmem>>, vector<32x64xf32>
    %cst_53 = arith.constant dense<0.000000e+00> : vector<8x64xf32>
    %110 = tpu.matmul %108, %109, %cst_53 {dimension_numbers = #tpu.dot_dimension_numbers<[1], [0], [0], [1], [0, 0, 1, 1], [], []>} : vector<8x32xf32>, vector<32x64xf32>, vector<8x64xf32> -> vector<8x64xf32>
    %c0_54 = arith.constant 0 : index
    %c0_55 = arith.constant 0 : index
    %111 = vector.load %arg16[%c0_54, %c0_55] : memref<1x64xf32, #tpu.memory_space<vmem>>, vector<1x64xf32>
    %112 = vector.broadcast %111 : vector<1x64xf32> to vector<8x64xf32>
    %113 = arith.addf %110, %112 : vector<8x64xf32>
    %cst_56 = arith.constant 0.000000e+00 : f32
    %114 = vector.broadcast %cst_56 : f32 to vector<8x64xf32>
    %115 = arith.cmpf oge, %113, %114 : vector<8x64xf32>
    %cst_57 = arith.constant 0.00999999977 : f32
    %116 = vector.broadcast %cst_57 : f32 to vector<8x64xf32>
    %117 = arith.mulf %116, %113 : vector<8x64xf32>
    %118 = arith.select %115, %113, %117 : vector<8x64xi1>, vector<8x64xf32>
    %c0_58 = arith.constant 0 : index
    %c0_59 = arith.constant 0 : index
    %119 = vector.load %arg17[%c0_58, %c0_59] : memref<64x64xf32, #tpu.memory_space<vmem>>, vector<64x64xf32>
    %cst_60 = arith.constant dense<0.000000e+00> : vector<8x64xf32>
    %120 = tpu.matmul %118, %119, %cst_60 {dimension_numbers = #tpu.dot_dimension_numbers<[1], [0], [0], [1], [0, 0, 1, 1], [], []>} : vector<8x64xf32>, vector<64x64xf32>, vector<8x64xf32> -> vector<8x64xf32>
    %c0_61 = arith.constant 0 : index
    %c0_62 = arith.constant 0 : index
    %121 = vector.load %arg18[%c0_61, %c0_62] : memref<1x64xf32, #tpu.memory_space<vmem>>, vector<1x64xf32>
    %122 = vector.broadcast %121 : vector<1x64xf32> to vector<8x64xf32>
    %123 = arith.addf %120, %122 : vector<8x64xf32>
    %cst_63 = arith.constant 0.000000e+00 : f32
    %124 = vector.broadcast %cst_63 : f32 to vector<8x64xf32>
    %125 = arith.cmpf oge, %123, %124 : vector<8x64xf32>
    %cst_64 = arith.constant 0.00999999977 : f32
    %126 = vector.broadcast %cst_64 : f32 to vector<8x64xf32>
    %127 = arith.mulf %126, %123 : vector<8x64xf32>
    %128 = arith.select %125, %123, %127 : vector<8x64xi1>, vector<8x64xf32>
    %129 = arith.addf %128, %118 : vector<8x64xf32>
    %c0_65 = arith.constant 0 : index
    %c0_66 = arith.constant 0 : index
    %130 = vector.load %arg19[%c0_65, %c0_66] : memref<64x4xf32, #tpu.memory_space<vmem>>, vector<64x4xf32>
    %cst_67 = arith.constant dense<0.000000e+00> : vector<8x4xf32>
    %131 = tpu.matmul %129, %130, %cst_67 {dimension_numbers = #tpu.dot_dimension_numbers<[1], [0], [0], [1], [0, 0, 1, 1], [], []>} : vector<8x64xf32>, vector<64x4xf32>, vector<8x4xf32> -> vector<8x4xf32>
    %c0_68 = arith.constant 0 : index
    %c0_69 = arith.constant 0 : index
    %132 = vector.load %arg20[%c0_68, %c0_69] : memref<1x4xf32, #tpu.memory_space<vmem>>, vector<1x4xf32>
    %133 = vector.broadcast %132 : vector<1x4xf32> to vector<8x4xf32>
    %134 = arith.addf %131, %133 : vector<8x4xf32>
    %c0_70 = arith.constant 0 : index
    %c0_71 = arith.constant 0 : index
    %135 = vector.load %arg21[%c0_70, %c0_71] : memref<8x4xf32, #tpu.memory_space<vmem>>, vector<8x4xf32>
    tpu.vector_store %arg21[%c0_70, %c0_71], %134 {strides = array<i32>} : memref<8x4xf32, #tpu.memory_space<vmem>>, vector<8x4xf32>,
    return
  }
  func.func @transform_0(%arg0: i32) -> (i32, i32) {
    %c0_i32 = arith.constant 0 : i32
    %c0_i32_0 = arith.constant 0 : i32
    return %arg0, %c0_i32 : i32, i32
  }
  func.func @transform_1(%arg0: i32) -> (i32, i32) {
    %c0_i32 = arith.constant 0 : i32
    %c0_i32_0 = arith.constant 0 : i32
    %c0_i32_1 = arith.constant 0 : i32
    return %c0_i32, %c0_i32_0 : i32, i32
  }
  func.func @transform_2(%arg0: i32) -> (i32, i32) {
    %c0_i32 = arith.constant 0 : i32
    %c0_i32_0 = arith.constant 0 : i32
    %c0_i32_1 = arith.constant 0 : i32
    return %c0_i32, %c0_i32_0 : i32, i32
  }
  func.func @transform_3(%arg0: i32) -> (i32, i32) {
    %c0_i32 = arith.constant 0 : i32
    %c0_i32_0 = arith.constant 0 : i32
    %c0_i32_1 = arith.constant 0 : i32
    return %c0_i32, %c0_i32_0 : i32, i32
  }
  func.func @transform_4(%arg0: i32) -> (i32, i32) {
    %c0_i32 = arith.constant 0 : i32
    %c0_i32_0 = arith.constant 0 : i32
    %c0_i32_1 = arith.constant 0 : i32
    return %c0_i32, %c0_i32_0 : i32, i32
  }
  func.func @transform_5(%arg0: i32) -> (i32, i32) {
    %c0_i32 = arith.constant 0 : i32
    %c0_i32_0 = arith.constant 0 : i32
    %c0_i32_1 = arith.constant 0 : i32
    return %c0_i32, %c0_i32_0 : i32, i32
  }
  func.func @transform_6(%arg0: i32) -> (i32, i32) {
    %c0_i32 = arith.constant 0 : i32
    %c0_i32_0 = arith.constant 0 : i32
    %c0_i32_1 = arith.constant 0 : i32
    return %c0_i32, %c0_i32_0 : i32, i32
  }
  func.func @transform_7(%arg0: i32) -> (i32, i32) {
    %c0_i32 = arith.constant 0 : i32
    %c0_i32_0 = arith.constant 0 : i32
    %c0_i32_1 = arith.constant 0 : i32
    return %c0_i32, %c0_i32_0 : i32, i32
  }
  func.func @transform_8(%arg0: i32) -> (i32, i32) {
    %c0_i32 = arith.constant 0 : i32
    %c0_i32_0 = arith.constant 0 : i32
    %c0_i32_1 = arith.constant 0 : i32
    return %c0_i32, %c0_i32_0 : i32, i32
  }
  func.func @transform_9(%arg0: i32) -> (i32, i32) {
    %c0_i32 = arith.constant 0 : i32
    %c0_i32_0 = arith.constant 0 : i32
    %c0_i32_1 = arith.constant 0 : i32
    return %c0_i32, %c0_i32_0 : i32, i32
  }
  func.func @transform_10(%arg0: i32) -> (i32, i32) {
    %c0_i32 = arith.constant 0 : i32
    %c0_i32_0 = arith.constant 0 : i32
    %c0_i32_1 = arith.constant 0 : i32
    return %c0_i32, %c0_i32_0 : i32, i32
  }
  func.func @transform_11(%arg0: i32) -> (i32, i32) {
    %c0_i32 = arith.constant 0 : i32
    %c0_i32_0 = arith.constant 0 : i32
    %c0_i32_1 = arith.constant 0 : i32
    return %c0_i32, %c0_i32_0 : i32, i32
  }
  func.func @transform_12(%arg0: i32) -> (i32, i32) {
    %c0_i32 = arith.constant 0 : i32
    %c0_i32_0 = arith.constant 0 : i32
    %c0_i32_1 = arith.constant 0 : i32
    return %c0_i32, %c0_i32_0 : i32, i32
  }
  func.func @transform_13(%arg0: i32) -> (i32, i32) {
    %c0_i32 = arith.constant 0 : i32
    %c0_i32_0 = arith.constant 0 : i32
    %c0_i32_1 = arith.constant 0 : i32
    return %c0_i32, %c0_i32_0 : i32, i32
  }
  func.func @transform_14(%arg0: i32) -> (i32, i32) {
    %c0_i32 = arith.constant 0 : i32
    %c0_i32_0 = arith.constant 0 : i32
    %c0_i32_1 = arith.constant 0 : i32
    return %c0_i32, %c0_i32_0 : i32, i32
  }
  func.func @transform_15(%arg0: i32) -> (i32, i32) {
    %c0_i32 = arith.constant 0 : i32
    %c0_i32_0 = arith.constant 0 : i32
    %c0_i32_1 = arith.constant 0 : i32
    return %c0_i32, %c0_i32_0 : i32, i32
  }
  func.func @transform_16(%arg0: i32) -> (i32, i32) {
    %c0_i32 = arith.constant 0 : i32
    %c0_i32_0 = arith.constant 0 : i32
    %c0_i32_1 = arith.constant 0 : i32
    return %c0_i32, %c0_i32_0 : i32, i32
  }
  func.func @transform_17(%arg0: i32) -> (i32, i32) {
    %c0_i32 = arith.constant 0 : i32
    %c0_i32_0 = arith.constant 0 : i32
    %c0_i32_1 = arith.constant 0 : i32
    return %c0_i32, %c0_i32_0 : i32, i32
  }
  func.func @transform_18(%arg0: i32) -> (i32, i32) {
    %c0_i32 = arith.constant 0 : i32
    %c0_i32_0 = arith.constant 0 : i32
    %c0_i32_1 = arith.constant 0 : i32
    return %c0_i32, %c0_i32_0 : i32, i32
  }
  func.func @transform_19(%arg0: i32) -> (i32, i32) {
    %c0_i32 = arith.constant 0 : i32
    %c0_i32_0 = arith.constant 0 : i32
    %c0_i32_1 = arith.constant 0 : i32
    return %c0_i32, %c0_i32_0 : i32, i32
  }
  func.func @transform_20(%arg0: i32) -> (i32, i32) {
    %c0_i32 = arith.constant 0 : i32
    %c0_i32_0 = arith.constant 0 : i32
    return %arg0, %c0_i32 : i32, i32
  }
}

</mosaic_0001>

<bundles_post_ra>
// kernel: tpu_custom_call.1
= control target key start
LH: loop header
LB: loop body
LE: loop exit
PB: predicated region body
PF: predicated region fallthrough
CT: control target
= control target key end

     0   :  { %vm74_vm0 = vcmask 261120   ;;  %s1165_s25 = smov 80   ;;  %s1167_s29 = smov 112   ;;  %vm633_vm8 = vcmask 523264   ;;  %vm659_vm9 = vcmask 64512   ;;  %vm1120_vm14 = vcmask 31744   ;;  %s2329_s1 = inlined_call_operand.vmem [shape: f32[32,128], index: 1, kind: input, shape index: {}]   ;;  %s2330_s3 = inlined_call_operand.vmem [shape: f32[128,384], index: 3, kind: input, shape index: {}]   ;;  %s2331_s0 = inlined_call_operand.vmem [shape: f32[8,32], index: 0, kind: input, shape index: {}]   ;;  %s2332_s2 = inlined_call_operand.vmem [shape: f32[1,128], index: 2, kind: input, shape index: {}]   ;;  %s2333_s5 = inlined_call_operand.vmem [shape: f32[128,128], index: 5, kind: input, shape index: {}]   ;;  %s2334_s4 = inlined_call_operand.vmem [shape: f32[1,384], index: 4, kind: input, shape index: {}]   ;;  %s2335_s6 = inlined_call_operand.vmem [shape: f32[1024,64], index: 6, kind: input, shape index: {}]   ;;  %s2336_s7 = inlined_call_operand.vmem [shape: f32[64,8], index: 7, kind: input, shape index: {}]   ;;  %s2337_s8 = inlined_call_operand.vmem [shape: f32[8,64], index: 8, kind: input, shape index: {}]   ;;  %s2338_s9 = inlined_call_operand.vmem [shape: f32[64,1024], index: 9, kind: input, shape index: {}]   ;;  %s2339_s10 = inlined_call_operand.vmem [shape: f32[128,128], index: 10, kind: input, shape index: {}]   ;;  %s2340_s11 = inlined_call_operand.vmem [shape: f32[1,128], index: 11, kind: input, shape index: {}]   ;;  %s2341_s12 = inlined_call_operand.vmem [shape: f32[128,32], index: 12, kind: input, shape index: {}]   ;;  %s2342_s13 = inlined_call_operand.vmem [shape: f32[1,32], index: 13, kind: input, shape index: {}]   ;;  %s2343_s14 = inlined_call_operand.vmem [shape: f32[32,64], index: 14, kind: input, shape index: {}]   ;;  %s2344_s15 = inlined_call_operand.vmem [shape: f32[1,64], index: 15, kind: input, shape index: {}]   ;;  %s2345_s16 = inlined_call_operand.vmem [shape: f32[64,64], index: 16, kind: input, shape index: {}]   ;;  %s2346_s17 = inlined_call_operand.vmem [shape: f32[1,64], index: 17, kind: input, shape index: {}]   ;;  %s2347_s18 = inlined_call_operand.vmem [shape: f32[64,4], index: 18, kind: input, shape index: {}]   ;;  %s2348_s19 = inlined_call_operand.vmem [shape: f32[1,4], index: 19, kind: input, shape index: {}]   ;;  %s2349_s20 = inlined_call_operand.vmem [shape: f32[8,4], index: 20, kind: output, shape index: {}]  }
   0x1   :  { %2353 = sst [smem:[#allocation2_spill]] %s2329_s1 }
   0x2   :  { %2354 = sst [smem:[#allocation3_spill]] %s2330_s3 }
   0x3   :  { %2355 = sst [smem:[#allocation4_spill]] %s2331_s0  ;;  %s1164_s0 = smov 96  }
   0x4   :  { %2356 = sst [smem:[#allocation5_spill]] %s2332_s2  ;;  %s1163_s2 = smov 16  }
   0x5   :  { %2357 = sst [smem:[#allocation6_spill]] %s2333_s5 }
   0x6   :  { %s2358_s23 = sld [smem:[#allocation2_spill]] }
   0x7   :  { %s2359_s28 = sld [smem:[#allocation3_spill]] }
   0x8   :  { %s2360_s3 = sld [smem:[#allocation4_spill]] }
   0x9   :  { %s2361_s21 = sld [smem:[#allocation6_spill]] }
   0xa   :  { %s2362_s5 = sld [smem:[#allocation5_spill]] }
   0xc   :  { %v69_v0 = vld [vmem:[%s2358_s23 + $0x18] sm:$0xff]  ;;  %v68_v1 = vld [vmem:[%s2358_s23 + $0x10] sm:$0xff]  ;;  %v67_v2 = vld [vmem:[%s2358_s23 + $0x8] sm:$0xff] }
   0xd   :  { %90 = vmatpush.msra.mxu0 %v69_v0  ;;  %v146_v3 = vld [vmem:[%s2359_s28 + $0x168] sm:$0xff]  ;;  %v147_v4 = vld [vmem:[%s2359_s28 + $0x170] sm:$0xff]  ;;  %v148_v5 = vld [vmem:[%s2359_s28 + $0x178] sm:$0xff] }
   0xe   :  { %157 = vmatpush.msra.mxu1 %v146_v3  ;;  %v143_v6 = vld [vmem:[%s2359_s28 + $0x150] sm:$0xff]  ;;  %177 = vmatpush.msra.mxu2 %v147_v4  ;;  %v144_v7 = vld [vmem:[%s2359_s28 + $0x158] sm:$0xff]  ;;  %v145_v8 = vld [vmem:[%s2359_s28 + $0x160] sm:$0xff] }
   0xf   :  { %91 = vmatpush.msra.mxu0 %v68_v1  ;;  %v140_v9 = vld [vmem:[%s2359_s28 + $0x138] sm:$0xff]  ;;  %v66_v10 = vld [vmem:[%s2358_s23] sm:$0xff]  ;;  %197 = vmatpush.msra.mxu3 %v148_v5  ;;  %v142_v13 = vld [vmem:[%s2359_s28 + $0x148] sm:$0xff] }
  0x10   :  { %158 = vmatpush.msra.mxu1 %v143_v6  ;;  %v141_v11 = vld [vmem:[%s2359_s28 + $0x140] sm:$0xff]  ;;  %178 = vmatpush.msra.mxu2 %v144_v7  ;;  %v138_v15 = vld [vmem:[%s2359_s28 + $0x128] sm:$0xff]  ;;  %v139_v16 = vld [vmem:[%s2359_s28 + $0x130] sm:$0xff] }
  0x11   :  { %92 = vmatpush.msra.mxu0 %v67_v2  ;;  %v65_v12 = vld [vmem:[%s2360_s3] sm:$0xff]  ;;  %198 = vmatpush.msra.mxu3 %v145_v8  ;;  %v134_v17 = vld [vmem:[%s2359_s28 + $0x108] sm:$0xff]  ;;  %v135_v18 = vld [vmem:[%s2359_s28 + $0x110] sm:$0xff] }
  0x12   :  { %159 = vmatpush.msra.mxu1 %v140_v9  ;;  %v137_v14 = vld [vmem:[%s2359_s28 + $0x120] sm:$0xff]  ;;  %179 = vmatpush.msra.mxu2 %v141_v11  ;;  %v136_v19 = vld [vmem:[%s2359_s28 + $0x118] sm:$0xff]  ;;  %v131_v20 = vld [vmem:[%s2359_s28 + $0xf0] sm:$0xff] }
  0x13   :  { %93 = vmatpush.msra.mxu0 %v66_v10  ;;  %199 = vmatpush.msra.mxu3 %v142_v13  ;;  %v132_v21 = vld [vmem:[%s2359_s28 + $0xf8] sm:$0xff]  ;;  %v133_v22 = vld [vmem:[%s2359_s28 + $0x100] sm:$0xff]  ;;  %v130_v25 = vld [vmem:[%s2359_s28 + $0xe8] sm:$0xff] }
  0x14   :  { %1126 = vmatmul.msk.f32.vlgmr.msra.gmra.mxu0 %vm74_vm0, %v65_v12  ;;  %160 = vmatpush.msra.mxu1 %v137_v14  ;;  %v128_v23 = vld [vmem:[%s2359_s28 + $0xd8] sm:$0xff]  ;;  %v129_v24 = vld [vmem:[%s2359_s28 + $0xe0] sm:$0xff]  ;;  %v126_v27 = vld [vmem:[%s2359_s28 + $0xc8] sm:$0xff] }
  0x15   :  { %180 = vmatpush.msra.mxu2 %v138_v15  ;;  %200 = vmatpush.msra.mxu3 %v139_v16  ;;  %v125_v26 = vld [vmem:[%s2359_s28 + $0xc0] sm:$0xff]  ;;  %v127_v28 = vld [vmem:[%s2359_s28 + $0xd0] sm:$0xff]  ;;  %v122_v29 = vld [vmem:[%s2359_s28 + $0xa8] sm:$0xff] }
  0x16   :  { %161 = vmatpush.msra.mxu1 %v134_v17  ;;  %v123_v30 = vld [vmem:[%s2359_s28 + $0xb0] sm:$0xff]  ;;  %v124_v31 = vld [vmem:[%s2359_s28 + $0xb8] sm:$0xff]  ;;  %v121_v34 = vld [vmem:[%s2359_s28 + $0xa0] sm:$0xff] }
  0x17   :  { %181 = vmatpush.msra.mxu2 %v135_v18  ;;  %201 = vmatpush.msra.mxu3 %v136_v19  ;;  %v119_v32 = vld [vmem:[%s2359_s28 + $0x90] sm:$0xff]  ;;  %v120_v33 = vld [vmem:[%s2359_s28 + $0x98] sm:$0xff]  ;;  %v117_v36 = vld [vmem:[%s2359_s28 + $0x80] sm:$0xff] }
  0x18   :  { %162 = vmatpush.msra.mxu1 %v131_v20  ;;  %v116_v35 = vld [vmem:[%s2359_s28 + $0x78] sm:$0xff]  ;;  %v118_v37 = vld [vmem:[%s2359_s28 + $0x88] sm:$0xff]  ;;  %v113_v38 = vld [vmem:[%s2359_s28 + $0x60] sm:$0xff] }
  0x19   :  { %182 = vmatpush.msra.mxu2 %v132_v21  ;;  %202 = vmatpush.msra.mxu3 %v133_v22  ;;  %v114_v39 = vld [vmem:[%s2359_s28 + $0x68] sm:$0xff]  ;;  %v115_v40 = vld [vmem:[%s2359_s28 + $0x70] sm:$0xff]  ;;  %v112_v43 = vld [vmem:[%s2359_s28 + $0x58] sm:$0xff] }
  0x1a   :  { %163 = vmatpush.msra.mxu1 %v128_v23  ;;  %v110_v41 = vld [vmem:[%s2359_s28 + $0x48] sm:$0xff]  ;;  %v111_v42 = vld [vmem:[%s2359_s28 + $0x50] sm:$0xff]  ;;  %v108_v45 = vld [vmem:[%s2359_s28 + $0x38] sm:$0xff] }
  0x1b   :  { %183 = vmatpush.msra.mxu2 %v129_v24  ;;  %203 = vmatpush.msra.mxu3 %v130_v25  ;;  %v107_v44 = vld [vmem:[%s2359_s28 + $0x30] sm:$0xff]  ;;  %v109_v46 = vld [vmem:[%s2359_s28 + $0x40] sm:$0xff]  ;;  %v104_v47 = vld [vmem:[%s2359_s28 + $0x18] sm:$0xff] }
  0x1c   :  { %164 = vmatpush.msra.mxu1 %v125_v26  ;;  %v105_v48 = vld [vmem:[%s2359_s28 + $0x20] sm:$0xff]  ;;  %v106_v49 = vld [vmem:[%s2359_s28 + $0x28] sm:$0xff]  ;;  %v103_v52 = vld [vmem:[%s2359_s28 + $0x10] sm:$0xff] }
  0x1d   :  { %184 = vmatpush.msra.mxu2 %v126_v27  ;;  %204 = vmatpush.msra.mxu3 %v127_v28  ;;  %v101_v50 = vld [vmem:[%s2359_s28] sm:$0xff]  ;;  %v102_v51 = vld [vmem:[%s2359_s28 + $0x8] sm:$0xff]  ;;  %v232_v53 = vld [vmem:[%s2361_s21 + $0x78] sm:$0xff] }
  0x1e   :  { %165 = vmatpush.msra.mxu1 %v122_v29  ;;  %v231_v54 = vld [vmem:[%s2361_s21 + $0x70] sm:$0xff]  ;;  %234 = vmatpush.msrb.mxu0 %v232_v53  ;;  %v230_v55 = vld [vmem:[%s2361_s21 + $0x68] sm:$0xff]  ;;  %v229_v56 = vld [vmem:[%s2361_s21 + $0x60] sm:$0xff] }
  0x1f   :  { %185 = vmatpush.msra.mxu2 %v123_v30  ;;  %205 = vmatpush.msra.mxu3 %v124_v31  ;;  %v228_v57 = vld [vmem:[%s2361_s21 + $0x58] sm:$0xff]  ;;  %v227_v58 = vld [vmem:[%s2361_s21 + $0x50] sm:$0xff]  ;;  %v226_v59 = vld [vmem:[%s2361_s21 + $0x48] sm:$0xff] }
  0x20   :  { %166 = vmatpush.msra.mxu1 %v119_v32  ;;  %235 = vmatpush.msrb.mxu0 %v231_v54  ;;  %v225_v60 = vld [vmem:[%s2361_s21 + $0x40] sm:$0xff]  ;;  %v224_v61 = vld [vmem:[%s2361_s21 + $0x38] sm:$0xff]  ;;  %v223_v62 = vld [vmem:[%s2361_s21 + $0x30] sm:$0xff] }
  0x21   :  { %186 = vmatpush.msra.mxu2 %v120_v33  ;;  %206 = vmatpush.msra.mxu3 %v121_v34  ;;  %v222_v63 = vld [vmem:[%s2361_s21 + $0x28] sm:$0xff]  ;;  %v221_v0 = vld [vmem:[%s2361_s21 + $0x20] sm:$0xff]  ;;  %v220_v2 = vld [vmem:[%s2361_s21 + $0x18] sm:$0xff] }
  0x22   :  { %167 = vmatpush.msra.mxu1 %v116_v35  ;;  %236 = vmatpush.msrb.mxu0 %v230_v55  ;;  %v1147_v1 = vld [vmem:[%s2362_s5] ss:$0 sm:$0xff]  ;;  %v219_v7 = vld [vmem:[%s2361_s21 + $0x10] sm:$0xff]  ;;  %v218_v8 = vld [vmem:[%s2361_s21 + $0x8] sm:$0xff]  ;;  %s1166_s5 = smov 64  }
  0x23   :  { %187 = vmatpush.msra.mxu2 %v117_v36  ;;  %207 = vmatpush.msra.mxu3 %v118_v37  ;;  %v217_v9 = vld [vmem:[%s2361_s21] sm:$0xff]  ;;  %v350_v19 = vld [vmem:[%s2335_s6 + $0x78] sm:$0xff]  ;;  %v349_v20 = vld [vmem:[%s2335_s6 + $0x70] sm:$0xff]  ;;  %s1162_s21 = smov 32  }
  0x24   :  { %168 = vmatpush.msra.mxu1 %v113_v38  ;;  %237 = vmatpush.msrb.mxu0 %v229_v56  ;;  %v1487_v10 = vld [vmem:[%s2334_s4] sm:$0x7]  ;;  %v348_v21 = vld [vmem:[%s2335_s6 + $0x68] sm:$0xff]  ;;  %v346_v23 = vld [vmem:[%s2335_s6 + $0x58] sm:$0xff]  ;;  %s1161_s4 = smov 48  }
  0x25   :  { %188 = vmatpush.msra.mxu2 %v114_v39  ;;  %208 = vmatpush.msra.mxu3 %v115_v40  ;;  %v151_v11 = vperm.slane %v1487_v10, 0  ;;  %v152_v15 = vperm.slane %v1487_v10, 1  ;;  %v347_v22 = vld [vmem:[%s2335_s6 + $0x60] sm:$0xff]  ;;  %v345_v24 = vld [vmem:[%s2335_s6 + $0x50] sm:$0xff]  ;;  %v344_v25 = vld [vmem:[%s2335_s6 + $0x48] sm:$0xff] }
  0x26   :  { %169 = vmatpush.msra.mxu1 %v110_v41  ;;  %238 = vmatpush.msrb.mxu0 %v228_v57  ;;  %v343_v26 = vld [vmem:[%s2335_s6 + $0x40] sm:$0xff]  ;;  %v342_v27 = vld [vmem:[%s2335_s6 + $0x38] sm:$0xff]  ;;  %v341_v28 = vld [vmem:[%s2335_s6 + $0x30] sm:$0xff] }
  0x27   :  { %189 = vmatpush.msra.mxu2 %v111_v42  ;;  %209 = vmatpush.msra.mxu3 %v112_v43  ;;  %v340_v29 = vld [vmem:[%s2335_s6 + $0x28] sm:$0xff]  ;;  %v339_v30 = vld [vmem:[%s2335_s6 + $0x20] sm:$0xff]  ;;  %v338_v31 = vld [vmem:[%s2335_s6 + $0x18] sm:$0xff] }
  0x28   :  { %170 = vmatpush.msra.mxu1 %v107_v44  ;;  %239 = vmatpush.msrb.mxu0 %v227_v58  ;;  %v337_v32 = vld [vmem:[%s2335_s6 + $0x10] sm:$0xff]  ;;  %v336_v33 = vld [vmem:[%s2335_s6 + $0x8] sm:$0xff]  ;;  %v335_v34 = vld [vmem:[%s2335_s6] sm:$0xff] }
  0x29   :  { %190 = vmatpush.msra.mxu2 %v108_v45  ;;  %210 = vmatpush.msra.mxu3 %v109_v46 }
  0x2a   :  { %171 = vmatpush.msra.mxu1 %v104_v47  ;;  %240 = vmatpush.msrb.mxu0 %v226_v59 }
  0x2b   :  { %191 = vmatpush.msra.mxu2 %v105_v48  ;;  %211 = vmatpush.msra.mxu3 %v106_v49 }
  0x2c   :  { %172 = vmatpush.msra.mxu1 %v101_v50  ;;  %241 = vmatpush.msrb.mxu0 %v225_v60 }
  0x2d   :  { %192 = vmatpush.msra.mxu2 %v102_v51  ;;  %212 = vmatpush.msra.mxu3 %v103_v52 }
  0x2e   :  { %255 = vmatpush.msrb.mxu1 %v232_v53  ;;  %242 = vmatpush.msrb.mxu0 %v224_v61 }
  0x2f   :  { %463 = vmatpush.msrb.mxu2 %v350_v19  ;;  %v390_v19 = vld [vmem:[%s2335_s6 + $0x1b8] sm:$0xff] }
  0x30   :  { %256 = vmatpush.msrb.mxu1 %v231_v54  ;;  %243 = vmatpush.msrb.mxu0 %v223_v62 }
  0x31   :  { %464 = vmatpush.msrb.mxu2 %v349_v20  ;;  %v358_v20 = vld [vmem:[%s2335_s6 + $0xb8] sm:$0xff] }
  0x32   :  { %257 = vmatpush.msrb.mxu1 %v230_v55  ;;  %244 = vmatpush.msrb.mxu0 %v222_v63 }
  0x33   :  { %465 = vmatpush.msrb.mxu2 %v348_v21  ;;  %v374_v21 = vld [vmem:[%s2335_s6 + $0x138] sm:$0xff] }
  0x34   :  { %258 = vmatpush.msrb.mxu1 %v229_v56  ;;  %245 = vmatpush.msrb.mxu0 %v221_v0  ;;  %v398_v56 = vld [vmem:[%s2335_s6 + $0x1f8] sm:$0xff] }
  0x35   :  { %466 = vmatpush.msrb.mxu2 %v347_v22  ;;  %v389_v22 = vld [vmem:[%s2335_s6 + $0x1b0] sm:$0xff] }
  0x36   :  { %259 = vmatpush.msrb.mxu1 %v228_v57  ;;  %246 = vmatpush.msrb.mxu0 %v220_v2  ;;  %v366_v57 = vld [vmem:[%s2335_s6 + $0xf8] sm:$0xff] }
  0x37   :  { %467 = vmatpush.msrb.mxu2 %v346_v23  ;;  %483 = vmatpush.msrb.mxu3 %v366_v57  ;;  %v357_v23 = vld [vmem:[%s2335_s6 + $0xb0] sm:$0xff]  ;;  %v426_v57 = vld [vmem:[%s2335_s6 + $0x2d8] sm:$0xff] }
  0x38   :  { %260 = vmatpush.msrb.mxu1 %v227_v58  ;;  %247 = vmatpush.msrb.mxu0 %v219_v7  ;;  %v382_v58 = vld [vmem:[%s2335_s6 + $0x178] sm:$0xff] }
  0x39   :  { %468 = vmatpush.msrb.mxu2 %v345_v24  ;;  %v373_v24 = vld [vmem:[%s2335_s6 + $0x130] sm:$0xff] }
  0x3a   :  { %261 = vmatpush.msrb.mxu1 %v226_v59  ;;  %248 = vmatpush.msrb.mxu0 %v218_v8  ;;  %v397_v59 = vld [vmem:[%s2335_s6 + $0x1f0] sm:$0xff] }
  0x3b   :  { %469 = vmatpush.msrb.mxu2 %v344_v25  ;;  %v388_v25 = vld [vmem:[%s2335_s6 + $0x1a8] sm:$0xff] }
  0x3c   :  { %262 = vmatpush.msrb.mxu1 %v225_v60  ;;  %249 = vmatpush.msrb.mxu0 %v217_v9  ;;  %v365_v60 = vld [vmem:[%s2335_s6 + $0xf0] sm:$0xff] }
  0x3d   :  { %470 = vmatpush.msrb.mxu2 %v343_v26  ;;  %484 = vmatpush.msrb.mxu3 %v365_v60  ;;  %v356_v26 = vld [vmem:[%s2335_s6 + $0xa8] sm:$0xff]  ;;  %v409_v60 = vld [vmem:[%s2335_s6 + $0x250] sm:$0xff] }
  0x3e   :  { %263 = vmatpush.msrb.mxu1 %v224_v61  ;;  %v381_v61 = vld [vmem:[%s2335_s6 + $0x170] sm:$0xff]  ;;  %503 = vmatpush.msra.mxu0 %v382_v58  ;;  %v442_v58 = vld [vmem:[%s2335_s6 + $0x358] sm:$0xff] }
  0x3f   :  { %471 = vmatpush.msrb.mxu2 %v342_v27  ;;  %v372_v27 = vld [vmem:[%s2335_s6 + $0x128] sm:$0xff] }
  0x40   :  { %264 = vmatpush.msrb.mxu1 %v223_v62  ;;  %v396_v62 = vld [vmem:[%s2335_s6 + $0x1e8] sm:$0xff]  ;;  %504 = vmatpush.msra.mxu0 %v381_v61  ;;  %v425_v61 = vld [vmem:[%s2335_s6 + $0x2d0] sm:$0xff] }
  0x41   :  { %472 = vmatpush.msrb.mxu2 %v341_v28  ;;  %v387_v28 = vld [vmem:[%s2335_s6 + $0x1a0] sm:$0xff] }
  0x42   :  { %265 = vmatpush.msrb.mxu1 %v222_v63  ;;  %v364_v63 = vld [vmem:[%s2335_s6 + $0xe8] sm:$0xff] }
  0x43   :  { %473 = vmatpush.msrb.mxu2 %v340_v29  ;;  %485 = vmatpush.msrb.mxu3 %v364_v63  ;;  %v355_v29 = vld [vmem:[%s2335_s6 + $0xa0] sm:$0xff]  ;;  %v441_v63 = vld [vmem:[%s2335_s6 + $0x350] sm:$0xff] }
  0x44   :  { %266 = vmatpush.msrb.mxu1 %v221_v0  ;;  %v380_v0 = vld [vmem:[%s2335_s6 + $0x168] sm:$0xff] }
  0x45   :  { %474 = vmatpush.msrb.mxu2 %v339_v30  ;;  %505 = vmatpush.msra.mxu0 %v380_v0  ;;  %v371_v30 = vld [vmem:[%s2335_s6 + $0x120] sm:$0xff]  ;;  %v460_v0 = vld [vmem:[%s2335_s6 + $0x3e8] sm:$0xff] }
  0x46   :  { %267 = vmatpush.msrb.mxu1 %v220_v2  ;;  %v363_v2 = vld [vmem:[%s2335_s6 + $0xe0] sm:$0xff] }
  0x47   :  { %475 = vmatpush.msrb.mxu2 %v338_v31  ;;  %486 = vmatpush.msrb.mxu3 %v363_v2  ;;  %v386_v31 = vld [vmem:[%s2335_s6 + $0x198] sm:$0xff]  ;;  %v424_v2 = vld [vmem:[%s2335_s6 + $0x2c8] sm:$0xff] }
  0x48   :  { %268 = vmatpush.msrb.mxu1 %v219_v7  ;;  %v153_v7 = vperm.slane %v1487_v10, 2  ;;  %v392_v10 = vld [vmem:[%s2335_s6 + $0x1c8] sm:$0xff] }
  0x49   :  { %476 = vmatpush.msrb.mxu2 %v337_v32  ;;  %v354_v32 = vld [vmem:[%s2335_s6 + $0x98] sm:$0xff] }
  0x4a   :  { %269 = vmatpush.msrb.mxu1 %v218_v8  ;;  %v393_v8 = vld [vmem:[%s2335_s6 + $0x1d0] sm:$0xff] }
  0x4b   :  { %477 = vmatpush.msrb.mxu2 %v336_v33  ;;  %v370_v33 = vld [vmem:[%s2335_s6 + $0x118] sm:$0xff] }
  0x4c   :  { %270 = vmatpush.msrb.mxu1 %v217_v9 }
  0x4d   :  { %478 = vmatpush.msrb.mxu2 %v335_v34  ;;  %v385_v34 = vld [vmem:[%s2335_s6 + $0x190] sm:$0xff] }
  0x91   :  { %v95_v3 = vpop.f32.mrf.mxu0 }
  0x92   :  { %v96_v4 = vadd.f32 %v1147_v1, %v95_v3  ;;  %v395_v1 = vld [vmem:[%s2335_s6 + $0x1e0] sm:$0xff] }
  0x93   :  { %v379_v3 = vld [vmem:[%s2335_s6 + $0x160] sm:$0xff] }
  0x94   :  { %v99_v5 = vmul.f32 0.01, %v96_v4  ;;  %vm98_vm1 = vcmp.ge.f32.partialorder %v96_v4, 0.0  ;;  %506 = vmatpush.msra.mxu0 %v379_v3  ;;  %v440_v3 = vld [vmem:[%s2335_s6 + $0x348] sm:$0xff] }
  0x96   :  { %v100_v6 = vsel %vm98_vm1, %v96_v4, %v99_v5  ;;  %v394_v4 = vld [vmem:[%s2335_s6 + $0x1d8] sm:$0xff] }
  0x97   :  { %173 = vmatmul.f32.vlgmr.msra.gmra.mxu1 %v100_v6  ;;  %193 = vmatmul.f32.vlgmr.msra.gmra.mxu2 %v100_v6  ;;  %v362_v5 = vld [vmem:[%s2335_s6 + $0xd8] sm:$0xff] }
  0x98   :  { %213 = vmatmul.f32.vlgmr.msra.gmra.mxu3 %v100_v6  ;;  %523 = vmatpush.msra.mxu1 %v398_v56  ;;  %v378_v6 = vld [vmem:[%s2335_s6 + $0x158] sm:$0xff] }
  0x99   :  { %487 = vmatpush.msrb.mxu3 %v362_v5  ;;  %507 = vmatpush.msra.mxu0 %v378_v6  ;;  %v410_v56 = vld [vmem:[%s2335_s6 + $0x258] sm:$0xff]  ;;  %v423_v5 = vld [vmem:[%s2335_s6 + $0x2c0] sm:$0xff] }
  0x9a   :  { %524 = vmatpush.msra.mxu1 %v397_v59  ;;  %v462_v59 = vld [vmem:[%s2335_s6 + $0x3f8] sm:$0xff]  ;;  %v439_v6 = vld [vmem:[%s2335_s6 + $0x340] sm:$0xff] }
  0x9c   :  { %525 = vmatpush.msra.mxu1 %v396_v62  ;;  %v461_v62 = vld [vmem:[%s2335_s6 + $0x3f0] sm:$0xff] }
  0x9e   :  { %526 = vmatpush.msra.mxu1 %v395_v1  ;;  %v408_v1 = vld [vmem:[%s2335_s6 + $0x248] sm:$0xff] }
  0xa0   :  { %527 = vmatpush.msra.mxu1 %v394_v4  ;;  %v407_v4 = vld [vmem:[%s2335_s6 + $0x240] sm:$0xff] }
  0xa2   :  { %528 = vmatpush.msra.mxu1 %v393_v8  ;;  %v406_v8 = vld [vmem:[%s2335_s6 + $0x238] sm:$0xff] }
  0xa4   :  { %529 = vmatpush.msra.mxu1 %v392_v10  ;;  %v405_v10 = vld [vmem:[%s2335_s6 + $0x230] sm:$0xff] }
 0x114   :  { %v174_v12 = vpop.f32.mrf.mxu1 }
 0x115   :  { %v1490_v13 = vadd.f32 %v174_v12, %v151_v11  ;;  %v361_v11 = vld [vmem:[%s2335_s6 + $0xd0] sm:$0xff] }
 0x116   :  { %v377_v12 = vld [vmem:[%s2335_s6 + $0x150] sm:$0xff]  ;;  %488 = vmatpush.msrb.mxu3 %v361_v11  ;;  %v458_v11 = vld [vmem:[%s2335_s6 + $0x3d8] sm:$0xff] }
 0x117   :  { %v233_v14 = vmul.f32 %v1490_v13, %v1490_v13  ;;  %508 = vmatpush.msra.mxu0 %v377_v12  ;;  %v438_v12 = vld [vmem:[%s2335_s6 + $0x338] sm:$0xff] }
 0x119   :  { %250 = vmatmul.f32.vlgmr.msrb.gmra.mxu0 %v233_v14  ;;  %v360_v14 = vld [vmem:[%s2335_s6 + $0xc8] sm:$0xff] }
 0x11a   :  { %v194_v16 = vpop.f32.mrf.mxu2  ;;  %489 = vmatpush.msrb.mxu3 %v360_v14  ;;  %v421_v14 = vld [vmem:[%s2335_s6 + $0x2b0] sm:$0xff] }
 0x11b   :  { %v1495_v17 = vadd.f32 %v194_v16, %v152_v15  ;;  %v214_v9 = vpop.f32.mrf.mxu3  ;;  %v376_v15 = vld [vmem:[%s2335_s6 + $0x148] sm:$0xff]  ;;  %v391_v16 = vld [vmem:[%s2335_s6 + $0x1c0] sm:$0xff] }
 0x11c   :  { %509 = vmatpush.msra.mxu0 %v376_v15  ;;  %530 = vmatpush.msra.mxu1 %v391_v16  ;;  %v457_v15 = vld [vmem:[%s2335_s6 + $0x3d0] sm:$0xff] }
 0x11d   :  { %v254_v18 = vmul.f32 %v1495_v17, %v1495_v17  ;;  %v437_v16 = vld [vmem:[%s2335_s6 + $0x330] sm:$0xff] }
 0x11e   :  { %531 = vmatpush.msra.mxu1 %v390_v19  ;;  %v420_v19 = vld [vmem:[%s2335_s6 + $0x2a8] sm:$0xff] }
 0x11f   :  { %271 = vmatmul.f32.vlgmr.msrb.gmra.mxu1 %v254_v18  ;;  %v375_v18 = vld [vmem:[%s2335_s6 + $0x140] sm:$0xff] }
 0x120   :  { %510 = vmatpush.msra.mxu0 %v375_v18  ;;  %532 = vmatpush.msra.mxu1 %v389_v22  ;;  %v404_v18 = vld [vmem:[%s2335_s6 + $0x228] sm:$0xff]  ;;  %v419_v22 = vld [vmem:[%s2335_s6 + $0x2a0] sm:$0xff] }
 0x122   :  { %511 = vmatpush.msra.mxu0 %v374_v21  ;;  %533 = vmatpush.msra.mxu1 %v388_v25  ;;  %v403_v21 = vld [vmem:[%s2335_s6 + $0x220] sm:$0xff]  ;;  %v402_v25 = vld [vmem:[%s2335_s6 + $0x218] sm:$0xff] }
 0x124   :  { %512 = vmatpush.msra.mxu0 %v373_v24  ;;  %534 = vmatpush.msra.mxu1 %v387_v28  ;;  %v455_v24 = vld [vmem:[%s2335_s6 + $0x3c0] sm:$0xff]  ;;  %v454_v28 = vld [vmem:[%s2335_s6 + $0x3b8] sm:$0xff] }
 0x126   :  { %513 = vmatpush.msra.mxu0 %v372_v27  ;;  %535 = vmatpush.msra.mxu1 %v386_v31  ;;  %v434_v27 = vld [vmem:[%s2335_s6 + $0x318] sm:$0xff]  ;;  %v433_v31 = vld [vmem:[%s2335_s6 + $0x310] sm:$0xff] }
 0x128   :  { %514 = vmatpush.msra.mxu0 %v371_v30  ;;  %536 = vmatpush.msra.mxu1 %v385_v34  ;;  %v417_v30 = vld [vmem:[%s2335_s6 + $0x290] sm:$0xff]  ;;  %v416_v34 = vld [vmem:[%s2335_s6 + $0x288] sm:$0xff] }
 0x12a   :  { %515 = vmatpush.msra.mxu0 %v370_v33  ;;  %v400_v33 = vld [vmem:[%s2335_s6 + $0x208] sm:$0xff] }
 0x196   :  { %v251_v35 = vpop.f32.mrf.mxu0 }
 0x197   :  { %v275_v36 = vmax.f32 %v251_v35, 1e-24  ;;  %v353_v35 = vld [vmem:[%s2335_s6 + $0x90] sm:$0xff] }
 0x199   :  { %1153 = vrsqrt.f32 %v275_v36  ;;  %vm282_vm3 = vweird.f32 %v275_v36 }
 0x19c   :  { %v272_v37 = vpop.f32.mrf.mxu1 }
 0x19d   :  { %v287_v38 = vmax.f32 %v272_v37, 1e-24  ;;  %v384_v37 = vld [vmem:[%s2335_s6 + $0x188] sm:$0xff] }
 0x19e   :  { %537 = vmatpush.msra.mxu1 %v384_v37  ;;  %v432_v37 = vld [vmem:[%s2335_s6 + $0x308] sm:$0xff] }
 0x19f   :  { %v1154_v39 = vpop.eup %1153  ;;  %1155 = vrsqrt.f32 %v287_v38  ;;  %vm294_vm6 = vweird.f32 %v287_v38 }
 0x1a0   :  { %v277_v40 = vmul.f32 %v1154_v39, %v275_v36  ;;  %vm283_vm2 = vweird.f32 %v1154_v39  ;;  %v369_v36 = vld [vmem:[%s2335_s6 + $0x110] sm:$0xff] }
 0x1a1   :  { %vm284_vm5 = vmor %vm282_vm3, %vm283_vm2  ;;  %516 = vmatpush.msra.mxu0 %v369_v36 }
 0x1a2   :  { %v278_v41 = vmul.f32 %v1154_v39, %v277_v40  ;;  %v383_v40 = vld [vmem:[%s2335_s6 + $0x180] sm:$0xff] }
 0x1a3   :  { %538 = vmatpush.msra.mxu1 %v383_v40  ;;  %v415_v40 = vld [vmem:[%s2335_s6 + $0x280] sm:$0xff] }
 0x1a4   :  { %v279_v42 = vmul.f32 0.5, %v278_v41  ;;  %v351_v41 = vld [vmem:[%s2335_s6 + $0x80] sm:$0xff] }
 0x1a5   :  { %v1156_v43 = vpop.eup %1155  ;;  %603 = vmatpush.msrb.mxu1 %v462_v59 }
 0x1a6   :  { %v280_v44 = vsub.f32 1.5, %v279_v42  ;;  %v289_v45 = vmul.f32 %v1156_v43, %v287_v38  ;;  %vm295_vm4 = vweird.f32 %v1156_v43  ;;  %v352_v38 = vld [vmem:[%s2335_s6 + $0x88] sm:$0xff]  ;;  %v367_v42 = vld [vmem:[%s2335_s6 + $0x100] sm:$0xff] }
 0x1a7   :  { %vm296_vm7 = vmor %vm294_vm6, %vm295_vm4  ;;  %604 = vmatpush.msrb.mxu1 %v461_v62  ;;  %v630_v62 = vld [vmem:[%s2336_s7 + $0x28] sm:$0xff] }
 0x1a8   :  { %v290_v46 = vmul.f32 %v1156_v43, %v289_v45  ;;  %v281_v47 = vmul.f32 %v1154_v39, %v280_v44  ;;  %v430_v44 = vld [vmem:[%s2335_s6 + $0x2f8] sm:$0xff] }
 0x1a9   :  { %v446_v45 = vld [vmem:[%s2335_s6 + $0x378] sm:$0xff]  ;;  %605 = vmatpush.msrb.mxu1 %v460_v0  ;;  %v627_v0 = vld [vmem:[%s2336_s7 + $0x10] sm:$0xff] }
 0x1aa   :  { %v291_v48 = vmul.f32 0.5, %v290_v46  ;;  %v285_v50 = vsel %vm284_vm5, %v1154_v39, %v281_v47  ;;  %v368_v39 = vld [vmem:[%s2335_s6 + $0x108] sm:$0xff]  ;;  %v413_v46 = vld [vmem:[%s2335_s6 + $0x270] sm:$0xff] }
 0x1ab   :  { %v1548_v53 = vmul.f32 %v285_v50, %v1490_v13  ;;  %v1616_v13 = vadd.f32 %v214_v9, %v153_v7  ;;  %517 = vmatpush.msra.mxu0 %v368_v39  ;;  %v429_v47 = vld [vmem:[%s2335_s6 + $0x2f0] sm:$0xff]  ;;  %v428_v50 = vld [vmem:[%s2335_s6 + $0x2e8] sm:$0xff]  ;;  %v459_v7 = vld [vmem:[%s2335_s6 + $0x3e0] sm:$0xff] }
 0x1ac   :  { %v292_v49 = vsub.f32 1.5, %v291_v48  ;;  %v445_v48 = vld [vmem:[%s2335_s6 + $0x370] sm:$0xff]  ;;  %606 = vmatpush.msrb.mxu1 %v459_v7  ;;  %v422_v9 = vld [vmem:[%s2335_s6 + $0x2b8] sm:$0xff]  ;;  %v399_v39 = vld [vmem:[%s2335_s6 + $0x200] sm:$0xff] }
 0x1ad   :  { %518 = vmatpush.msra.mxu0 %v367_v42  ;;  %v451_v42 = vld [vmem:[%s2335_s6 + $0x3a0] sm:$0xff] }
 0x1ae   :  { %v293_v51 = vmul.f32 %v1156_v43, %v292_v49  ;;  %v412_v49 = vld [vmem:[%s2335_s6 + $0x268] sm:$0xff]  ;;  %607 = vmatpush.msrb.mxu1 %v458_v11 }
 0x1af   :  { %583 = vmatpush.msrb.mxu0 %v446_v45  ;;  %v448_v45 = vld [vmem:[%s2335_s6 + $0x388] sm:$0xff] }
 0x1b0   :  { %v297_v52 = vsel %vm296_vm7, %v1156_v43, %v293_v51  ;;  %v414_v43 = vld [vmem:[%s2335_s6 + $0x278] sm:$0xff]  ;;  %v444_v51 = vld [vmem:[%s2335_s6 + $0x368] sm:$0xff]  ;;  %608 = vmatpush.msrb.mxu1 %v457_v15 }
 0x1b1   :  { %v298_v54 = vmul.f32 %v297_v52, %v1495_v17  ;;  %v359_v17 = vld [vmem:[%s2335_s6 + $0xc0] sm:$0xff]  ;;  %543 = vmatpush.msra.mxu2 %v414_v43  ;;  %584 = vmatpush.msrb.mxu0 %v445_v48  ;;  %v450_v43 = vld [vmem:[%s2335_s6 + $0x398] sm:$0xff] }
 0x1b2   :  { %490 = vmatpush.msrb.mxu3 %v359_v17  ;;  %v411_v52 = vld [vmem:[%s2335_s6 + $0x260] sm:$0xff]  ;;  %v456_v17 = vld [vmem:[%s2335_s6 + $0x3c8] sm:$0xff] }
 0x1b3   :  { %310 = vrot.lane.b32.xlu2 %v298_v54, %s1161_s4  ;;  %305 = vrot.lane.b32.xlu1 %v298_v54, %s1162_s21  ;;  %v299_v55 = vmul.f32 %v298_v54, %v1548_v53 }
 0x1b4   :  { %300 = vrot.lane.b32.xlu0 %v298_v54, %s1163_s2  ;;  %491 = vmatpush.msrb.mxu3 %v358_v20  ;;  %v436_v20 = vld [vmem:[%s2335_s6 + $0x328] sm:$0xff] }
 0x1b5   :  { %479 = vmatmul.f32.vlgmr.msrb.gmra.mxu2 %v299_v55  ;;  %v443_v55 = vld [vmem:[%s2335_s6 + $0x360] sm:$0xff]  ;;  %585 = vmatpush.msrb.mxu0 %v444_v51 }
 0x1b6   :  { %492 = vmatpush.msrb.mxu3 %v357_v23  ;;  %544 = vmatpush.msra.mxu2 %v413_v46  ;;  %v435_v23 = vld [vmem:[%s2335_s6 + $0x320] sm:$0xff] }
 0x1b7   :  { %586 = vmatpush.msrb.mxu0 %v443_v55  ;;  %609 = vmatpush.msrb.mxu1 %v456_v17  ;;  %v447_v46 = vld [vmem:[%s2335_s6 + $0x380] sm:$0xff] }
 0x1b8   :  { %493 = vmatpush.msrb.mxu3 %v356_v26  ;;  %545 = vmatpush.msra.mxu2 %v412_v49  ;;  %v418_v26 = vld [vmem:[%s2335_s6 + $0x298] sm:$0xff] }
 0x1b9   :  { %587 = vmatpush.msrb.mxu0 %v442_v58  ;;  %610 = vmatpush.msrb.mxu1 %v455_v24  ;;  %v741_v24 = vld [vmem:[%s2338_s9 + $0x1c8] sm:$0xff] }
 0x1ba   :  { %494 = vmatpush.msrb.mxu3 %v355_v29  ;;  %546 = vmatpush.msra.mxu2 %v411_v52  ;;  %v401_v29 = vld [vmem:[%s2335_s6 + $0x210] sm:$0xff] }
 0x1bb   :  { %325 = vrot.lane.b32.xlu2 %v298_v54, %s1164_s0  ;;  %320 = vrot.lane.b32.xlu1 %v298_v54, %s1165_s25 }
 0x1bc   :  { %315 = vrot.lane.b32.xlu0 %v298_v54, %s1166_s5  ;;  %495 = vmatpush.msrb.mxu3 %v354_v32  ;;  %v453_v32 = vld [vmem:[%s2335_s6 + $0x3b0] sm:$0xff] }
 0x1bd   :  { %547 = vmatpush.msra.mxu2 %v410_v56  ;;  %588 = vmatpush.msrb.mxu0 %v441_v63  ;;  %v628_v63 = vld [vmem:[%s2336_s7 + $0x18] sm:$0xff] }
 0x1be   :  { %496 = vmatpush.msrb.mxu3 %v353_v35  ;;  %611 = vmatpush.msrb.mxu1 %v454_v28  ;;  %v452_v35 = vld [vmem:[%s2335_s6 + $0x3a8] sm:$0xff]  ;;  %v734_v28 = vld [vmem:[%s2338_s9 + $0x190] sm:$0xff] }
 0x1bf   :  { %548 = vmatpush.msra.mxu2 %v409_v60  ;;  %589 = vmatpush.msrb.mxu0 %v440_v3  ;;  %v632_v60 = vld [vmem:[%s2336_s7 + $0x38] sm:$0xff] }
 0x1c0   :  { %497 = vmatpush.msrb.mxu3 %v352_v38  ;;  %612 = vmatpush.msrb.mxu1 %v453_v32  ;;  %v717_v32 = vld [vmem:[%s2338_s9 + $0x108] sm:$0xff] }
 0x1c1   :  { %549 = vmatpush.msra.mxu2 %v408_v1  ;;  %590 = vmatpush.msrb.mxu0 %v439_v6  ;;  %v626_v1 = vld [vmem:[%s2336_s7 + $0x8] sm:$0xff] }
 0x1c2   :  { %498 = vmatpush.msrb.mxu3 %v351_v41  ;;  %613 = vmatpush.msrb.mxu1 %v452_v35  ;;  %v431_v41 = vld [vmem:[%s2335_s6 + $0x300] sm:$0xff] }
 0x1c3   :  { %307 = vrot.lane.b32.xlu2 %v1616_v13, %s1162_s21  ;;  %302 = vrot.lane.b32.xlu1 %v1616_v13, %s1163_s2  ;;  %v708_v35 = vld [vmem:[%s2338_s9 + $0xc0] sm:$0xff] }
 0x1c4   :  { %330 = vrot.lane.b32.xlu0 %v298_v54, %s1167_s29  ;;  %563 = vmatpush.msra.mxu3 %v430_v44  ;;  %v427_v54 = vld [vmem:[%s2335_s6 + $0x2e0] sm:$0xff]  ;;  %v449_v44 = vld [vmem:[%s2335_s6 + $0x390] sm:$0xff] }
 0x1c5   :  { %550 = vmatpush.msra.mxu2 %v407_v4  ;;  %591 = vmatpush.msrb.mxu0 %v438_v12 }
 0x1c6   :  { %564 = vmatpush.msra.mxu3 %v429_v47  ;;  %614 = vmatpush.msrb.mxu1 %v451_v42  ;;  %v702_v42 = vld [vmem:[%s2338_s9 + $0x90] sm:$0xff] }
 0x1c7   :  { %551 = vmatpush.msra.mxu2 %v406_v8  ;;  %592 = vmatpush.msrb.mxu0 %v437_v16 }
 0x1c8   :  { %565 = vmatpush.msra.mxu3 %v428_v50  ;;  %615 = vmatpush.msrb.mxu1 %v450_v43  ;;  %v692_v43 = vld [vmem:[%s2338_s9 + $0x40] sm:$0xff] }
 0x1c9   :  { %552 = vmatpush.msra.mxu2 %v405_v10  ;;  %593 = vmatpush.msrb.mxu0 %v436_v20 }
 0x1ca   :  { %566 = vmatpush.msra.mxu3 %v427_v54  ;;  %616 = vmatpush.msrb.mxu1 %v449_v44  ;;  %v721_v44 = vld [vmem:[%s2338_s9 + $0x128] sm:$0xff] }
 0x1cb   :  { %322 = vrot.lane.b32.xlu2 %v1616_v13, %s1165_s25  ;;  %317 = vrot.lane.b32.xlu1 %v1616_v13, %s1166_s5 }
 0x1cc   :  { %312 = vrot.lane.b32.xlu0 %v1616_v13, %s1161_s4  ;;  %567 = vmatpush.msra.mxu3 %v426_v57 }
 0x1cd   :  { %553 = vmatpush.msra.mxu2 %v404_v18  ;;  %594 = vmatpush.msrb.mxu0 %v435_v23  ;;  %v732_v23 = vld [vmem:[%s2338_s9 + $0x180] sm:$0xff] }
 0x1ce   :  { %568 = vmatpush.msra.mxu3 %v425_v61  ;;  %617 = vmatpush.msrb.mxu1 %v448_v45  ;;  %v631_v61 = vld [vmem:[%s2336_s7 + $0x30] sm:$0xff]  ;;  %v693_v45 = vld [vmem:[%s2338_s9 + $0x48] sm:$0xff] }
 0x1cf   :  { %554 = vmatpush.msra.mxu2 %v403_v21  ;;  %595 = vmatpush.msrb.mxu0 %v434_v27  ;;  %v658_v21 = vld [vmem:[%s2337_s8] sm:$0xff]  ;;  %v733_v27 = vld [vmem:[%s2338_s9 + $0x188] sm:$0xff] }
 0x1d0   :  { %569 = vmatpush.msra.mxu3 %v424_v2  ;;  %618 = vmatpush.msrb.mxu1 %v447_v46  ;;  %v625_v2 = vld [vmem:[%s2336_s7] sm:$0xff]  ;;  %v694_v46 = vld [vmem:[%s2338_s9 + $0x50] sm:$0xff] }
 0x1d1   :  { %555 = vmatpush.msra.mxu2 %v402_v25  ;;  %596 = vmatpush.msrb.mxu0 %v433_v31  ;;  %v742_v25 = vld [vmem:[%s2338_s9 + $0x1d0] sm:$0xff]  ;;  %v716_v31 = vld [vmem:[%s2338_s9 + $0x100] sm:$0xff] }
 0x1d2   :  { %570 = vmatpush.msra.mxu3 %v423_v5 }
 0x1d3   :  { %332 = vrot.lane.b32.xlu1 %v1616_v13, %s1167_s29  ;;  %556 = vmatpush.msra.mxu2 %v401_v29  ;;  %v725_v29 = vld [vmem:[%s2338_s9 + $0x148] sm:$0xff] }
 0x1d4   :  { %327 = vrot.lane.b32.xlu0 %v1616_v13, %s1164_s0  ;;  %571 = vmatpush.msra.mxu3 %v422_v9 }
 0x1d5   :  { %557 = vmatpush.msra.mxu2 %v400_v33  ;;  %597 = vmatpush.msrb.mxu0 %v432_v37  ;;  %v718_v33 = vld [vmem:[%s2338_s9 + $0x110] sm:$0xff]  ;;  %v709_v37 = vld [vmem:[%s2338_s9 + $0xc8] sm:$0xff] }
 0x1d6   :  { %572 = vmatpush.msra.mxu3 %v421_v14 }
 0x1d7   :  { %558 = vmatpush.msra.mxu2 %v399_v39  ;;  %598 = vmatpush.msrb.mxu0 %v431_v41  ;;  %v700_v39 = vld [vmem:[%s2338_s9 + $0x80] sm:$0xff]  ;;  %v701_v41 = vld [vmem:[%s2338_s9 + $0x88] sm:$0xff] }
 0x1d8   :  { %573 = vmatpush.msra.mxu3 %v420_v19 }
 0x1d9   :  { %645 = vmatpush.msrb.mxu2 %v632_v60  ;;  %v703_v60 = vld [vmem:[%s2338_s9 + $0x98] sm:$0xff] }
 0x1da   :  { %574 = vmatpush.msra.mxu3 %v419_v22  ;;  %v740_v22 = vld [vmem:[%s2338_s9 + $0x1c0] sm:$0xff] }
 0x1db   :  { %646 = vmatpush.msrb.mxu2 %v631_v61 }
 0x1dc   :  { %575 = vmatpush.msra.mxu3 %v418_v26  ;;  %v724_v26 = vld [vmem:[%s2338_s9 + $0x140] sm:$0xff] }
 0x1dd   :  { %647 = vmatpush.msrb.mxu2 %v630_v62  ;;  %v744_v62 = vld [vmem:[%s2338_s9 + $0x1e0] sm:$0xff] }
 0x1de   :  { %576 = vmatpush.msra.mxu3 %v417_v30  ;;  %v726_v30 = vld [vmem:[%s2338_s9 + $0x150] sm:$0xff] }
 0x1e0   :  { %577 = vmatpush.msra.mxu3 %v416_v34  ;;  %v745_v34 = vld [vmem:[%s2338_s9 + $0x1e8] sm:$0xff] }
 0x1e2   :  { %578 = vmatpush.msra.mxu3 %v415_v40  ;;  %v729_v40 = vld [vmem:[%s2338_s9 + $0x168] sm:$0xff] }
 0x20d   :  { %v311_v36 = vpop.permute.xlu2 %310 }
 0x20e   :  { %v314_v38 = vmul.f32 %v311_v36, %v1548_v53  ;;  %v737_v36 = vld [vmem:[%s2338_s9 + $0x1a8] sm:$0xff] }
 0x210   :  { %539 = vmatmul.f32.vlgmr.msra.gmra.mxu1 %v314_v38  ;;  %v710_v38 = vld [vmem:[%s2338_s9 + $0xd0] sm:$0xff] }
 0x211   :  { %859 = vmatpush.msra.mxu1 %v745_v34  ;;  %v934_v34 = vld [vmem:[%s2339_s10 + $0x40] sm:$0xff] }
 0x213   :  { %860 = vmatpush.msra.mxu1 %v737_v36  ;;  %v932_v36 = vld [vmem:[%s2339_s10 + $0x30] sm:$0xff] }
 0x215   :  { %v326_v51 = vpop.permute.xlu2 %325  ;;  %861 = vmatpush.msra.mxu1 %v729_v40  ;;  %v928_v40 = vld [vmem:[%s2339_s10 + $0x10] sm:$0xff] }
 0x216   :  { %v329_v54 = vmul.f32 %v326_v51, %v1548_v53  ;;  %v686_v51 = vld [vmem:[%s2338_s9 + $0x10] sm:$0xff] }
 0x217   :  { %862 = vmatpush.msra.mxu1 %v721_v44  ;;  %v983_v44 = vld [vmem:[%s2341_s12 + $0x70] sm:$0xff] }
 0x225   :  { %v306_v47 = vpop.permute.xlu1 %305 }
 0x226   :  { %v309_v48 = vmul.f32 %v306_v47, %v1548_v53  ;;  %v301_v49 = vpop.permute.xlu0 %300  ;;  %v684_v47 = vld [vmem:[%s2338_s9] sm:$0xff] }
 0x227   :  { %v304_v50 = vmul.f32 %v301_v49, %v1548_v53  ;;  %v743_v49 = vld [vmem:[%s2338_s9 + $0x1d8] sm:$0xff] }
 0x228   :  { %519 = vmatmul.f32.vlgmr.msra.gmra.mxu0 %v309_v48  ;;  %v713_v48 = vld [vmem:[%s2338_s9 + $0xe8] sm:$0xff] }
 0x229   :  { %499 = vmatmul.f32.vlgmr.msrb.gmra.mxu3 %v304_v50  ;;  %759 = vmatpush.msra.mxu0 %v740_v22  ;;  %v685_v50 = vld [vmem:[%s2338_s9 + $0x8] sm:$0xff]  ;;  %v940_v22 = vld [vmem:[%s2339_s10 + $0x70] sm:$0xff] }
 0x22a   :  { %678 = vmatpush.msrb.mxu3 %v658_v21  ;;  %863 = vmatpush.msra.mxu1 %v713_v48  ;;  %v941_v21 = vld [vmem:[%s2339_s10 + $0x78] sm:$0xff] }
 0x22b   :  { %760 = vmatpush.msra.mxu0 %v732_v23  ;;  %v731_v23 = vld [vmem:[%s2338_s9 + $0x178] sm:$0xff] }
 0x22d   :  { %v321_v52 = vpop.permute.xlu1 %320  ;;  %761 = vmatpush.msra.mxu0 %v724_v26  ;;  %v715_v26 = vld [vmem:[%s2338_s9 + $0xf8] sm:$0xff] }
 0x22e   :  { %v324_v55 = vmul.f32 %v321_v52, %v1548_v53  ;;  %v316_v56 = vpop.permute.xlu0 %315  ;;  %v705_v52 = vld [vmem:[%s2338_s9 + $0xa8] sm:$0xff] }
 0x22f   :  { %v319_v57 = vmul.f32 %v316_v56, %v1548_v53  ;;  %762 = vmatpush.msra.mxu0 %v716_v31  ;;  %v727_v56 = vld [vmem:[%s2338_s9 + $0x158] sm:$0xff]  ;;  %864 = vmatpush.msra.mxu1 %v705_v52  ;;  %v977_v52 = vld [vmem:[%s2341_s12 + $0x40] sm:$0xff] }
 0x230   :  { %599 = vmatmul.f32.vlgmr.msrb.gmra.mxu0 %v329_v54  ;;  %v735_v54 = vld [vmem:[%s2338_s9 + $0x198] sm:$0xff] }
 0x231   :  { %559 = vmatmul.f32.vlgmr.msra.gmra.mxu2 %v319_v57  ;;  %579 = vmatmul.f32.vlgmr.msra.gmra.mxu3 %v324_v55  ;;  %v746_v55 = vld [vmem:[%s2338_s9 + $0x1f0] sm:$0xff]  ;;  %v937_v31 = vld [vmem:[%s2339_s10 + $0x58] sm:$0xff] }
 0x232   :  { %779 = vmatpush.msra.mxu3 %v741_v24  ;;  %763 = vmatpush.msra.mxu0 %v708_v35  ;;  %v738_v57 = vld [vmem:[%s2338_s9 + $0x1b0] sm:$0xff]  ;;  %v939_v24 = vld [vmem:[%s2339_s10 + $0x68] sm:$0xff]  ;;  %v933_v35 = vld [vmem:[%s2339_s10 + $0x38] sm:$0xff] }
 0x234   :  { %780 = vmatpush.msra.mxu3 %v733_v27  ;;  %764 = vmatpush.msra.mxu0 %v700_v39  ;;  %v707_v27 = vld [vmem:[%s2338_s9 + $0xb8] sm:$0xff] }
 0x235   :  { %v929_v39 = vld [vmem:[%s2339_s10 + $0x18] sm:$0xff]  ;;  %v303_v48 = vpop.permute.xlu1 %302 }
 0x236   :  { %v331_v58 = vpop.permute.xlu0 %330  ;;  %781 = vmatpush.msra.mxu3 %v725_v29  ;;  %765 = vmatpush.msra.mxu0 %v692_v43  ;;  %v691_v29 = vld [vmem:[%s2338_s9 + $0x38] sm:$0xff] }
 0x237   :  { %v334_v59 = vmul.f32 %v331_v58, %v1548_v53  ;;  %v629_v53 = vld [vmem:[%s2336_s7 + $0x20] sm:$0xff]  ;;  %v719_v58 = vld [vmem:[%s2338_s9 + $0x118] sm:$0xff] }
 0x238   :  { %648 = vmatpush.msrb.mxu2 %v629_v53  ;;  %v480_v3 = vpop.f32.mrf.mxu2  ;;  %782 = vmatpush.msra.mxu3 %v717_v32  ;;  %v936_v32 = vld [vmem:[%s2339_s10 + $0x50] sm:$0xff]  ;;  %v984_v43 = vld [vmem:[%s2341_s12 + $0x78] sm:$0xff] }
 0x239   :  { %619 = vmatmul.f32.vlgmr.msrb.gmra.mxu1 %v334_v59  ;;  %766 = vmatpush.msra.mxu0 %v684_v47  ;;  %v711_v59 = vld [vmem:[%s2338_s9 + $0xd8] sm:$0xff] }
 0x23a   :  { %649 = vmatpush.msrb.mxu2 %v628_v63  ;;  %783 = vmatpush.msra.mxu3 %v709_v37  ;;  %v736_v63 = vld [vmem:[%s2338_s9 + $0x1a0] sm:$0xff]  ;;  %v931_v37 = vld [vmem:[%s2339_s10 + $0x28] sm:$0xff]  ;;  %v980_v47 = vld [vmem:[%s2341_s12 + $0x58] sm:$0xff] }
 0x23b   :  { %819 = vmatpush.msrb.mxu0 %v743_v49 }
 0x23c   :  { %650 = vmatpush.msrb.mxu2 %v627_v0  ;;  %784 = vmatpush.msra.mxu3 %v701_v41  ;;  %v728_v0 = vld [vmem:[%s2338_s9 + $0x160] sm:$0xff]  ;;  %v927_v41 = vld [vmem:[%s2339_s10 + $0x8] sm:$0xff] }
 0x23d   :  { %820 = vmatpush.msrb.mxu0 %v735_v54  ;;  %v308_v54 = vpop.permute.xlu2 %307 }
 0x23e   :  { %651 = vmatpush.msrb.mxu2 %v626_v1  ;;  %785 = vmatpush.msra.mxu3 %v693_v45  ;;  %v697_v1 = vld [vmem:[%s2338_s9 + $0x68] sm:$0xff] }
 0x23f   :  { %821 = vmatpush.msrb.mxu0 %v727_v56  ;;  %865 = vmatpush.msra.mxu1 %v697_v1  ;;  %v982_v45 = vld [vmem:[%s2341_s12 + $0x68] sm:$0xff] }
 0x240   :  { %652 = vmatpush.msrb.mxu2 %v625_v2  ;;  %786 = vmatpush.msra.mxu3 %v685_v50  ;;  %v730_v2 = vld [vmem:[%s2338_s9 + $0x170] sm:$0xff] }
 0x241   :  { %822 = vmatpush.msrb.mxu0 %v719_v58  ;;  %v979_v50 = vld [vmem:[%s2341_s12 + $0x50] sm:$0xff] }
 0x242   :  { %799 = vmatpush.msra.mxu2 %v742_v25  ;;  %v723_v25 = vld [vmem:[%s2338_s9 + $0x138] sm:$0xff] }
 0x243   :  { %823 = vmatpush.msrb.mxu0 %v711_v59  ;;  %v976_v59 = vld [vmem:[%s2341_s12 + $0x38] sm:$0xff] }
 0x244   :  { %800 = vmatpush.msra.mxu2 %v734_v28  ;;  %v699_v28 = vld [vmem:[%s2338_s9 + $0x78] sm:$0xff] }
 0x245   :  { %824 = vmatpush.msrb.mxu0 %v703_v60  ;;  %v313_v60 = vpop.permute.xlu0 %312 }
 0x246   :  { %801 = vmatpush.msra.mxu2 %v726_v30  ;;  %v938_v30 = vld [vmem:[%s2339_s10 + $0x60] sm:$0xff] }
 0x248   :  { %802 = vmatpush.msra.mxu2 %v718_v33  ;;  %v935_v33 = vld [vmem:[%s2339_s10 + $0x48] sm:$0xff] }
 0x24a   :  { %803 = vmatpush.msra.mxu2 %v710_v38  ;;  %v930_v38 = vld [vmem:[%s2339_s10 + $0x20] sm:$0xff] }
 0x24c   :  { %804 = vmatpush.msra.mxu2 %v702_v42  ;;  %v926_v42 = vld [vmem:[%s2339_s10] sm:$0xff] }
 0x24e   :  { %805 = vmatpush.msra.mxu2 %v694_v46  ;;  %v981_v46 = vld [vmem:[%s2341_s12 + $0x60] sm:$0xff] }
 0x250   :  { %806 = vmatpush.msra.mxu2 %v686_v51  ;;  %v978_v51 = vld [vmem:[%s2341_s12 + $0x48] sm:$0xff] }
 0x28d   :  { %v540_v8 = vpop.f32.mrf.mxu1 }
 0x2a5   :  { %v520_v6 = vpop.f32.mrf.mxu0 }
 0x2ac   :  { %v500_v4 = vpop.f32.mrf.mxu3 }
 0x2ad   :  { %v501_v5 = vadd.f32 %v500_v4, %v480_v3  ;;  %v600_v15 = vpop.f32.mrf.mxu0  ;;  %v695_v3 = vld [vmem:[%s2338_s9 + $0x58] sm:$0xff]  ;;  %v720_v4 = vld [vmem:[%s2338_s9 + $0x120] sm:$0xff] }
 0x2ae   :  { %825 = vmatpush.msrb.mxu0 %v695_v3  ;;  %v973_v3 = vld [vmem:[%s2341_s12 + $0x20] sm:$0xff] }
 0x2af   :  { %v521_v7 = vadd.f32 %v520_v6, %v501_v5  ;;  %v689_v5 = vld [vmem:[%s2338_s9 + $0x28] sm:$0xff]  ;;  %v722_v6 = vld [vmem:[%s2338_s9 + $0x130] sm:$0xff] }
 0x2b0   :  { %866 = vmatpush.msra.mxu1 %v689_v5 }
 0x2b1   :  { %v541_v9 = vadd.f32 %v540_v8, %v521_v7  ;;  %v687_v7 = vld [vmem:[%s2338_s9 + $0x18] sm:$0xff]  ;;  %v712_v8 = vld [vmem:[%s2338_s9 + $0xe0] sm:$0xff] }
 0x2b2   :  { %826 = vmatpush.msrb.mxu0 %v687_v7  ;;  %989 = vmatpush.msrb.mxu1 %v984_v43 }
 0x2b4   :  { %v560_v11 = vpop.f32.mrf.mxu2  ;;  %v580_v10 = vpop.f32.mrf.mxu3  ;;  %990 = vmatpush.msrb.mxu1 %v983_v44  ;;  %v1048_v44 = vld [vmem:[%s2345_s16 + $0x10] sm:$0xff] }
 0x2b5   :  { %v561_v12 = vadd.f32 %v560_v11, %v541_v9  ;;  %v714_v9 = vld [vmem:[%s2338_s9 + $0xf0] sm:$0xff]  ;;  %v704_v11 = vld [vmem:[%s2338_s9 + $0xa0] sm:$0xff] }
 0x2b6   :  { %v620_v17 = vpop.f32.mrf.mxu1  ;;  %991 = vmatpush.msrb.mxu1 %v982_v45  ;;  %v1047_v45 = vld [vmem:[%s2345_s16 + $0x8] sm:$0xff] }
 0x2b7   :  { %v581_v14 = vadd.f32 %v580_v10, %v561_v12  ;;  %v706_v12 = vld [vmem:[%s2338_s9 + $0xb0] sm:$0xff]  ;;  %v696_v10 = vld [vmem:[%s2338_s9 + $0x60] sm:$0xff] }
 0x2b8   :  { %992 = vmatpush.msrb.mxu1 %v981_v46  ;;  %v1046_v46 = vld [vmem:[%s2345_s16] sm:$0xff] }
 0x2b9   :  { %v601_v16 = vadd.f32 %v600_v15, %v581_v14  ;;  %v698_v14 = vld [vmem:[%s2338_s9 + $0x70] sm:$0xff]  ;;  %v688_v15 = vld [vmem:[%s2338_s9 + $0x20] sm:$0xff] }
 0x2ba   :  { %993 = vmatpush.msrb.mxu1 %v980_v47  ;;  %v1092_v47 = vld [vmem:[%s2347_s18 + $0x38] sm:$0xff] }
 0x2bb   :  { %v621_v18 = vadd.f32 %v620_v17, %v601_v16  ;;  %v690_v16 = vld [vmem:[%s2338_s9 + $0x30] sm:$0xff] }
 0x2bc   :  { %994 = vmatpush.msrb.mxu1 %v979_v50  ;;  %v1089_v50 = vld [vmem:[%s2347_s18 + $0x20] sm:$0xff] }
 0x2bd   :  { %v623_v19 = vmul.f32 1.442695, %v621_v18 }
 0x2be   :  { %995 = vmatpush.msrb.mxu1 %v978_v51  ;;  %v1150_v51 = vld [vmem:[%s2344_s15] ss:$0 sm:$0xff] }
 0x2bf   :  { %1157 = vpow2.f32 %v623_v19  ;;  %v747_v19 = vld [vmem:[%s2338_s9 + $0x1f8] sm:$0xff] }
 0x2c0   :  { %996 = vmatpush.msrb.mxu1 %v977_v52 }
 0x2c2   :  { %997 = vmatpush.msrb.mxu1 %v976_v59  ;;  %v1086_v59 = vld [vmem:[%s2347_s18 + $0x8] sm:$0xff] }
 0x2c5   :  { %v1943_v20 = vpop.eup %1157 }
 0x2c6   :  { %1127 = vmatmul.msk.f32.vlgmr.msrb.gmra.mxu2 %vm633_vm8, %v1943_v20 }
 0x2c7   :  { %879 = vmatpush.msrb.mxu2 %v746_v55 }
 0x2c9   :  { %880 = vmatpush.msrb.mxu2 %v738_v57 }
 0x2cb   :  { %881 = vmatpush.msrb.mxu2 %v730_v2 }
 0x2cd   :  { %882 = vmatpush.msrb.mxu2 %v722_v6 }
 0x2cf   :  { %883 = vmatpush.msrb.mxu2 %v714_v9  ;;  %v323_v9 = vpop.permute.xlu2 %322 }
 0x2d1   :  { %884 = vmatpush.msrb.mxu2 %v706_v12 }
 0x2d3   :  { %885 = vmatpush.msrb.mxu2 %v698_v14  ;;  %v328_v14 = vpop.permute.xlu0 %327 }
 0x2d5   :  { %886 = vmatpush.msrb.mxu2 %v690_v16 }
 0x349   :  { %v654_v61 = vpop.f32.mrf.mxu2 }
 0x34a   :  { %1159 = vrcp.f32 %v654_v61 }
 0x350   :  { %v1160_v53 = vpop.eup %1159 }
 0x351   :  { %1128 = vmatmul.msk.f32.vlgmr.msrb.gmra.mxu3 %vm659_vm9, %v1160_v53 }
 0x352   :  { %839 = vmatpush.msrb.mxu3 %v744_v62 }
 0x354   :  { %840 = vmatpush.msrb.mxu3 %v736_v63  ;;  %v975_v63 = vld [vmem:[%s2341_s12 + $0x30] sm:$0xff] }
 0x355   :  { %998 = vmatpush.msrb.mxu1 %v975_v63 }
 0x356   :  { %841 = vmatpush.msrb.mxu3 %v728_v0  ;;  %v318_v0 = vpop.permute.xlu1 %317 }
 0x358   :  { %842 = vmatpush.msrb.mxu3 %v720_v4 }
 0x35a   :  { %843 = vmatpush.msrb.mxu3 %v712_v8  ;;  %v972_v8 = vld [vmem:[%s2341_s12 + $0x18] sm:$0xff] }
 0x35c   :  { %844 = vmatpush.msrb.mxu3 %v704_v11 }
 0x35e   :  { %845 = vmatpush.msrb.mxu3 %v696_v10 }
 0x360   :  { %846 = vmatpush.msrb.mxu3 %v688_v15 }
 0x3d4   :  { %v680_v17 = vpop.f32.mrf.mxu3 }
 0x3d5   :  { %v683_v18 = vmul.f32 %v1943_v20, %v680_v17  ;;  %v739_v20 = vld [vmem:[%s2338_s9 + $0x1b8] sm:$0xff] }
 0x3d7   :  { %1129 = vmatmul.msk.f32.vlgmr.msra.gmra.mxu0 %vm633_vm8, %v683_v18  ;;  %1130 = vmatmul.msk.f32.vlgmr.msra.gmra.mxu3 %vm633_vm8, %v683_v18 }
 0x3d8   :  { %1131 = vmatmul.msk.f32.vlgmr.msra.gmra.mxu2 %vm633_vm8, %v683_v18  ;;  %1134 = vmatmul.msk.f32.vlgmr.msra.gmra.mxu1 %vm633_vm8, %v683_v18 }
 0x3d9   :  { %899 = vmatpush.msra.mxu0 %v747_v19  ;;  %946 = vmatpush.msra.mxu3 %v941_v21 }
 0x3db   :  { %900 = vmatpush.msra.mxu0 %v739_v20  ;;  %947 = vmatpush.msra.mxu3 %v940_v22  ;;  %v971_v22 = vld [vmem:[%s2341_s12 + $0x10] sm:$0xff] }
 0x3dd   :  { %901 = vmatpush.msra.mxu0 %v731_v23  ;;  %948 = vmatpush.msra.mxu3 %v939_v24  ;;  %v970_v23 = vld [vmem:[%s2341_s12 + $0x8] sm:$0xff]  ;;  %v969_v24 = vld [vmem:[%s2341_s12] sm:$0xff] }
 0x3df   :  { %902 = vmatpush.msra.mxu0 %v723_v25  ;;  %1133 = vmatmul.msk.f32.vlgmr.msrb.gmra.mxu3 %vm633_vm8, %v683_v18  ;;  %v1015_v25 = vld [vmem:[%s2343_s14 + $0x18] sm:$0xff] }
 0x3e0   :  { %1132 = vmatmul.msk.f32.vlgmr.msrb.gmra.mxu0 %vm633_vm8, %v683_v18  ;;  %1135 = vmatmul.msk.f32.vlgmr.msrb.gmra.mxu2 %vm633_vm8, %v683_v18 }
 0x3e1   :  { %903 = vmatpush.msra.mxu0 %v715_v26  ;;  %949 = vmatpush.msra.mxu3 %v938_v30  ;;  %v1148_v26 = vld [vmem:[%s2340_s11] ss:$0 sm:$0xff] }
 0x3e2   :  { %1035 = vmatpush.msra.mxu2 %v1015_v25 }
 0x3e3   :  { %904 = vmatpush.msra.mxu0 %v707_v27  ;;  %950 = vmatpush.msra.mxu3 %v937_v31  ;;  %v1014_v31 = vld [vmem:[%s2343_s14 + $0x10] sm:$0xff] }
 0x3e4   :  { %1036 = vmatpush.msra.mxu2 %v1014_v31 }
 0x3e5   :  { %905 = vmatpush.msra.mxu0 %v699_v28  ;;  %951 = vmatpush.msra.mxu3 %v936_v32  ;;  %v1013_v32 = vld [vmem:[%s2343_s14 + $0x8] sm:$0xff] }
 0x3e6   :  { %1037 = vmatpush.msra.mxu2 %v1013_v32 }
 0x3e7   :  { %906 = vmatpush.msra.mxu0 %v691_v29  ;;  %952 = vmatpush.msra.mxu3 %v935_v33  ;;  %v1012_v33 = vld [vmem:[%s2343_s14] sm:$0xff] }
 0x3e8   :  { %1136 = vmatmul.msk.f32.vlgmr.msra.gmra.mxu0 %vm633_vm8, %v683_v18  ;;  %v333_v18 = vpop.permute.xlu1 %332  ;;  %1038 = vmatpush.msra.mxu2 %v1012_v33 }
 0x3e9   :  { %953 = vmatpush.msra.mxu3 %v934_v34  ;;  %v1053_v34 = vld [vmem:[%s2345_s16 + $0x38] sm:$0xff] }
 0x3ea   :  { %1069 = vmatpush.msrb.mxu0 %v1053_v34  ;;  %1108 = vmatpush.msrb.mxu2 %v1092_v47 }
 0x3eb   :  { %954 = vmatpush.msra.mxu3 %v933_v35  ;;  %v1052_v35 = vld [vmem:[%s2345_s16 + $0x30] sm:$0xff] }
 0x3ec   :  { %1070 = vmatpush.msrb.mxu0 %v1052_v35 }
 0x3ed   :  { %955 = vmatpush.msra.mxu3 %v932_v36  ;;  %v1051_v36 = vld [vmem:[%s2345_s16 + $0x28] sm:$0xff] }
 0x3ee   :  { %1071 = vmatpush.msrb.mxu0 %v1051_v36 }
 0x3ef   :  { %956 = vmatpush.msra.mxu3 %v931_v37  ;;  %v1050_v37 = vld [vmem:[%s2345_s16 + $0x20] sm:$0xff] }
 0x3f0   :  { %1072 = vmatpush.msrb.mxu0 %v1050_v37 }
 0x3f1   :  { %957 = vmatpush.msra.mxu3 %v930_v38  ;;  %v1049_v38 = vld [vmem:[%s2345_s16 + $0x18] sm:$0xff] }
 0x3f2   :  { %1073 = vmatpush.msrb.mxu0 %v1049_v38 }
 0x3f3   :  { %958 = vmatpush.msra.mxu3 %v929_v39  ;;  %v1149_v39 = vld [vmem:[%s2342_s13] ss:$0 sm:$0xff] }
 0x3f4   :  { %1074 = vmatpush.msrb.mxu0 %v1048_v44 }
 0x3f5   :  { %959 = vmatpush.msra.mxu3 %v928_v40 }
 0x3f6   :  { %1075 = vmatpush.msrb.mxu0 %v1047_v45 }
 0x3f7   :  { %960 = vmatpush.msra.mxu3 %v927_v41 }
 0x3f8   :  { %1076 = vmatpush.msrb.mxu0 %v1046_v46 }
 0x3f9   :  { %961 = vmatpush.msra.mxu3 %v926_v42 }
 0x454   :  { %v768_v49 = vpop.f32.mrf.mxu0 }
 0x455   :  { %v911_v56 = vmul.f32 %v768_v49, %v1616_v13  ;;  %v974_v13 = vld [vmem:[%s2341_s12 + $0x28] sm:$0xff]  ;;  %v868_v4 = vpop.f32.mrf.mxu1 }
 0x456   :  { %999 = vmatpush.msrb.mxu1 %v974_v13  ;;  %v920_v12 = vmul.f32 %v868_v4, %v323_v9  ;;  %v1090_v49 = vld [vmem:[%s2347_s18 + $0x28] sm:$0xff]  ;;  %v1152_v13 = vld [vmem:[%s2348_s19] ss:$0 sm:$0xff] }
 0x458   :  { %1000 = vmatpush.msrb.mxu1 %v973_v3 }
 0x45a   :  { %v788_v55 = vpop.f32.mrf.mxu3  ;;  %1001 = vmatpush.msrb.mxu1 %v972_v8 }
 0x45b   :  { %v912_v57 = vmul.f32 %v788_v55, %v303_v48  ;;  %v808_v58 = vpop.f32.mrf.mxu2  ;;  %v1091_v48 = vld [vmem:[%s2347_s18 + $0x30] sm:$0xff] }
 0x45c   :  { %v914_v62 = vmul.f32 %v808_v58, %v308_v54  ;;  %1002 = vmatpush.msrb.mxu1 %v971_v22  ;;  %1109 = vmatpush.msrb.mxu2 %v1091_v48  ;;  %v1087_v58 = vld [vmem:[%s2347_s18 + $0x10] sm:$0xff] }
 0x45d   :  { %v913_v61 = vadd.f32 %v912_v57, %v911_v56  ;;  %v828_v53 = vpop.f32.mrf.mxu0  ;;  %v1088_v57 = vld [vmem:[%s2347_s18 + $0x18] sm:$0xff] }
 0x45e   :  { %v916_v2 = vmul.f32 %v828_v53, %v313_v60  ;;  %1003 = vmatpush.msrb.mxu1 %v970_v23  ;;  %1110 = vmatpush.msrb.mxu2 %v1090_v49  ;;  %v1085_v60 = vld [vmem:[%s2347_s18] sm:$0xff] }
 0x45f   :  { %v915_v1 = vadd.f32 %v914_v62, %v913_v61  ;;  %v1151_v61 = vld [vmem:[%s2346_s17] ss:$0 sm:$0xff] }
 0x460   :  { %1004 = vmatpush.msrb.mxu1 %v969_v24  ;;  %1111 = vmatpush.msrb.mxu2 %v1089_v50 }
 0x461   :  { %v917_v6 = vadd.f32 %v916_v2, %v915_v1 }
 0x462   :  { %v848_v5 = vpop.f32.mrf.mxu3  ;;  %1112 = vmatpush.msrb.mxu2 %v1088_v57 }
 0x463   :  { %v918_v7 = vmul.f32 %v848_v5, %v318_v0  ;;  %v888_v11 = vpop.f32.mrf.mxu2 }
 0x464   :  { %v922_v17 = vmul.f32 %v888_v11, %v328_v14  ;;  %1113 = vmatpush.msrb.mxu2 %v1087_v58 }
 0x465   :  { %v919_v10 = vadd.f32 %v918_v7, %v917_v6  ;;  %v908_v15 = vpop.f32.mrf.mxu0 }
 0x466   :  { %v924_v21 = vmul.f32 %v908_v15, %v333_v18  ;;  %1114 = vmatpush.msrb.mxu2 %v1086_v59 }
 0x467   :  { %v921_v16 = vadd.f32 %v920_v12, %v919_v10 }
 0x468   :  { %1115 = vmatpush.msrb.mxu2 %v1085_v60 }
 0x469   :  { %v923_v19 = vadd.f32 %v922_v17, %v921_v16 }
 0x46b   :  { %v925_v20 = vadd.f32 %v924_v21, %v923_v19 }
 0x46d   :  { %962 = vmatmul.f32.vlgmr.msra.gmra.mxu3 %v925_v20 }
 0x4f0   :  { %v963_v27 = vpop.f32.mrf.mxu3 }
 0x4f1   :  { %v964_v28 = vadd.f32 %v1148_v26, %v963_v27 }
 0x4f3   :  { %vm966_vm10 = vcmp.ge.f32.partialorder %v964_v28, 0.0  ;;  %v967_v29 = vmul.f32 0.01, %v964_v28 }
 0x4f5   :  { %v968_v30 = vsel %vm966_vm10, %v964_v28, %v967_v29 }
 0x4f6   :  { %1005 = vmatmul.f32.vlgmr.msrb.gmra.mxu1 %v968_v30 }
 0x573   :  { %v1006_v40 = vpop.f32.mrf.mxu1 }
 0x574   :  { %v1007_v41 = vadd.f32 %v1149_v39, %v1006_v40 }
 0x576   :  { %vm1009_vm11 = vcmp.ge.f32.partialorder %v1007_v41, 0.0  ;;  %v1010_v42 = vmul.f32 0.01, %v1007_v41 }
 0x578   :  { %v1011_v43 = vsel %vm1009_vm11, %v1007_v41, %v1010_v42 }
 0x579   :  { %1137 = vmatmul.msk.f32.vlgmr.msra.gmra.mxu2 %vm74_vm0, %v1011_v43 }
 0x5fc   :  { %v1040_v52 = vpop.f32.mrf.mxu2 }
 0x5fd   :  { %v1041_v54 = vadd.f32 %v1150_v51, %v1040_v52 }
 0x5ff   :  { %vm1043_vm12 = vcmp.ge.f32.partialorder %v1041_v54, 0.0  ;;  %v1044_v55 = vmul.f32 0.01, %v1041_v54 }
 0x601   :  { %v1045_v56 = vsel %vm1043_vm12, %v1041_v54, %v1044_v55 }
 0x602   :  { %1138 = vmatmul.msk.f32.vlgmr.msrb.gmra.mxu0 %vm633_vm8, %v1045_v56 }
 0x67f   :  { %v1078_v62 = vpop.f32.mrf.mxu0 }
 0x680   :  { %v1079_v53 = vadd.f32 %v1151_v61, %v1078_v62 }
 0x682   :  { %vm1081_vm13 = vcmp.ge.f32.partialorder %v1079_v53, 0.0  ;;  %v1082_v63 = vmul.f32 0.01, %v1079_v53 }
 0x684   :  { %v1083_v0 = vsel %vm1081_vm13, %v1079_v53, %v1082_v63 }
 0x685   :  { %v1084_v1 = vadd.f32 %v1083_v0, %v1045_v56 }
 0x687   :  { %1139 = vmatmul.msk.f32.vlgmr.msrb.gmra.mxu2 %vm633_vm8, %v1084_v1 }
 0x70a   :  { %v1117_v2 = vpop.f32.mrf.mxu2 }
 0x70b   :  { %v1118_v3 = vadd.f32 %v1152_v13, %v1117_v2 }
 0x70d   :  { %1121 = vst.msk [vmem:[%s2349_s20] sm:$0xff] %vm1120_vm14, %v1118_v3 }

</bundles_post_ra>
